<compile_context>
chip_gen: v7x
topology: tpu7x:2x2x1
jax: 0.10.0
libtpu: 0.0.40
codegen_flags: <defaults>
</compile_context>

<pallas_src>
import math

import jax
import jax.numpy as jnp
from jax.experimental import pallas as pl

# ---- small, module-consistent configuration -------------------------------
NUM_CLASSES = 5
PROJ_DIM = 32          # projection_dim (d_model)
SEQ_LEN = 8            # sequence_length
NHEADS = 4
HEAD_DIM = PROJ_DIM // NHEADS
NUM_LAYERS = 2         # num_encoder_layers
FEED_FORWARD = 64
DIM_MODALITIES = (3, 3)
NUM_CHANNELS = sum(DIM_MODALITIES)
BATCH = 2
LN_EPS = 1e-5
BN_EPS = 1e-5
LANE = 128             # lane-dense slab width / padded logits width
NEG_INF = -1e30

# ---- weight-slab row layout (batch independent) ----------------------------
W_PROJ = 0                                  # proj_w  [C, D]
W_LAYER0 = 8                                # first per-layer block
W_QKV = 0                                   # wqkv    [D, 3D]
W_O = W_QKV + PROJ_DIM                      # wo      [D, D]
W_FF1 = W_O + PROJ_DIM                      # w1      [D, FF]
W_FF2 = W_FF1 + PROJ_DIM                    # w2      [FF, D]
W_LAYER_STRIDE = W_FF2 + FEED_FORWARD       # rows per layer (=160)
W_ROWS = W_LAYER0 + NUM_LAYERS * W_LAYER_STRIDE


def _round_up(x, m):
    return ((x + m - 1) // m) * m


def _v_layout(n, out_rows):
    """Row offsets of the vector/bias slab for a flattened batch of n rows."""
    lay = {}
    lay["pbpe"] = 0                        # proj bias + positional enc [n, D]
    lay["mask"] = n                        # block-diag attention bias  [n, n]
    lay["layer"] = 2 * n                   # 8 rows per transformer layer
    f = 2 * n + NUM_LAYERS * 8
    lay["lng"], lay["lnb"], lay["hb"] = f, f + 1, f + 2
    lay["sel"] = _round_up(f + 3, 8)       # batch selector       [out_rows, n]
    lay["hwrep"] = lay["sel"] + out_rows   # BN-folded head weight [n, LANE]
    lay["rows"] = _round_up(lay["hwrep"] + n, 8)
    return lay


# ---- in-kernel helpers (pure jnp, traced inside the Pallas kernel) ----------
def _layernorm(t, g, b):
    # t: [N, D], g/b: [1, D]
    m = jnp.mean(t, axis=-1, keepdims=True)
    v = jnp.mean((t - m) ** 2, axis=-1, keepdims=True)
    return (t - m) * jax.lax.rsqrt(v + LN_EPS) * g + b


# ---- fused kernel -----------------------------------------------------------
def haptr_kernel(x_ref, w_ref, v_ref, o_ref):
    """Full HAPTR forward: encoder + transformer layers + pooled head."""
    n = x_ref.shape[0]          # B * SEQ_LEN
    d = PROJ_DIM
    lay = _v_layout(n, o_ref.shape[0])
    scale = 1.0 / math.sqrt(HEAD_DIM)

    # --- SignalEncoderLinear: Linear(C->D) + (bias + positional encoding) ---
    h = jnp.dot(x_ref[...], w_ref[W_PROJ:W_PROJ + NUM_CHANNELS, 0:d],
                preferred_element_type=jnp.float32) + v_ref[0:n, 0:d]

    # Precomputed block-diagonal additive attention bias (batch separation).
    bias = v_ref[lay["mask"]:lay["mask"] + n, 0:n].reshape(1, n, n)

    # --- Transformer encoder layers (post-norm, eval mode) -------------------
    for l in range(NUM_LAYERS):                               # static unroll
        wb = W_LAYER0 + l * W_LAYER_STRIDE
        vb = lay["layer"] + l * 8

        # Fused QKV projection: one [n, D] x [D, 3D] matmul.
        qkv = jnp.dot(h, w_ref[wb + W_QKV:wb + W_QKV + d, 0:3 * d],
                      preferred_element_type=jnp.float32) \
            + v_ref[vb + 0:vb + 1, 0:3 * d]

        # Move heads to a leading batch axis: [n, 3D] -> [3H, Hd, n] -> [3H, n, Hd]
        qkv_h = jnp.swapaxes(qkv.T.reshape(3 * NHEADS, HEAD_DIM, n), -1, -2)
        q = qkv_h[0:NHEADS]
        k = qkv_h[NHEADS:2 * NHEADS]
        v = qkv_h[2 * NHEADS:3 * NHEADS]

        # All heads in one batched contraction; batch handled by the mask.
        s = jnp.einsum("hqd,hkd->hqk", q, k,
                       preferred_element_type=jnp.float32) * scale + bias
        m = jnp.max(s, axis=-1, keepdims=True)
        e = jnp.exp(s - m)
        p = e * pl.reciprocal(jnp.sum(e, axis=-1, keepdims=True), approx=True)
        ctx = jnp.einsum("hqk,hkd->hqd", p, v,
                         preferred_element_type=jnp.float32)      # [H, n, Hd]
        # Head re-concat via contiguous reshape (no concatenate): -> [n, D]
        ctx = jnp.swapaxes(ctx, -1, -2).reshape(d, n).T

        attn = jnp.dot(ctx, w_ref[wb + W_O:wb + W_O + d, 0:d],
                       preferred_element_type=jnp.float32) \
            + v_ref[vb + 1:vb + 2, 0:d]
        h = _layernorm(h + attn,
                       v_ref[vb + 2:vb + 3, 0:d], v_ref[vb + 3:vb + 4, 0:d])

        # Feed-forward (GELU), flattened [n, *] layout.
        ff = jax.nn.gelu(
            jnp.dot(h, w_ref[wb + W_FF1:wb + W_FF1 + d, 0:FEED_FORWARD],
                    preferred_element_type=jnp.float32)
            + v_ref[vb + 4:vb + 5, 0:FEED_FORWARD])
        ff = jnp.dot(ff, w_ref[wb + W_FF2:wb + W_FF2 + FEED_FORWARD, 0:d],
                     preferred_element_type=jnp.float32) \
            + v_ref[vb + 5:vb + 6, 0:d]
        h = _layernorm(h + ff,
                       v_ref[vb + 6:vb + 7, 0:d], v_ref[vb + 7:vb + 8, 0:d])

    # --- Final LayerNorm -> mean over D -> folded BN + Linear head ----------
    hf = _layernorm(h, v_ref[lay["lng"]:lay["lng"] + 1, 0:d],
                    v_ref[lay["lnb"]:lay["lnb"] + 1, 0:d])
    pooled = jnp.mean(hf, axis=-1, keepdims=True)                 # [n, 1]
    hw = v_ref[lay["hwrep"]:lay["hwrep"] + n, :] * pooled         # [n, 128]
    sel = v_ref[lay["sel"]:lay["sel"] + o_ref.shape[0], 0:n]      # [8, n]
    o_ref[...] = jnp.dot(sel, hw, preferred_element_type=jnp.float32) \
        + v_ref[lay["hb"]:lay["hb"] + 1, :]


# ---- parameters -------------------------------------------------------------
def _sinusoidal_pe(seq_len, dim):
    pos = jnp.arange(seq_len, dtype=jnp.float32)[:, None]
    div = jnp.exp(jnp.arange(0, dim, 2, dtype=jnp.float32)
                  * (-math.log(10000.0) / dim))
    pe = jnp.zeros((seq_len, dim), jnp.float32)
    pe = pe.at[:, 0::2].set(jnp.sin(pos * div))
    pe = pe.at[:, 1::2].set(jnp.cos(pos * div))
    return pe


def init_params(key):
    D, FF, S, C, L = PROJ_DIM, FEED_FORWARD, SEQ_LEN, NUM_CHANNELS, NUM_LAYERS
    ks = iter(jax.random.split(key, 16))

    def nrm(shape, scale):
        return (scale * jax.random.normal(next(ks), shape)).astype(jnp.float32)

    return {
        # signal encoder
        "proj_w": nrm((C, D), 1.0 / math.sqrt(C)),
        "proj_b": nrm((1, D), 0.02),
        "pe": _sinusoidal_pe(S, D),
        # transformer layers, stacked along a leading layer axis
        "wqkv": nrm((L, D, 3 * D), 1.0 / math.sqrt(D)),   # [wq | wk | wv]
        "bqkv": jnp.zeros((L, 1, 3 * D), jnp.float32),
        "wo": nrm((L, D, D), 1.0 / math.sqrt(D)),
        "bo": jnp.zeros((L, 1, D), jnp.float32),
        "ln1g": jnp.ones((L, 1, D), jnp.float32),
        "ln1b": jnp.zeros((L, 1, D), jnp.float32),
        "w1": nrm((L, D, FF), 1.0 / math.sqrt(D)),
        "b1": jnp.zeros((L, 1, FF), jnp.float32),
        "w2": nrm((L, FF, D), 1.0 / math.sqrt(FF)),
        "b2": jnp.zeros((L, 1, D), jnp.float32),
        "ln2g": jnp.ones((L, 1, D), jnp.float32),
        "ln2b": jnp.zeros((L, 1, D), jnp.float32),
        # final TransformerEncoder LayerNorm
        "lng": jnp.ones((1, D), jnp.float32),
        "lnb": jnp.zeros((1, D), jnp.float32),
        # BatchNorm1d(sequence_length), eval-mode running stats
        "rm": jnp.zeros((1, S), jnp.float32),
        "rv": jnp.ones((1, S), jnp.float32),
        "bng": jnp.ones((1, S), jnp.float32),
        "bnb": jnp.zeros((1, S), jnp.float32),
        # mlp head Linear(S -> num_classes), weight stored transposed [S, C_out]
        "hw": nrm((S, NUM_CLASSES), 1.0 / math.sqrt(S)),
        "hb": nrm((1, NUM_CLASSES), 0.02),
    }


def pack_params(params, batch):
    """One-time packing of all parameters into two lane-dense VMEM slabs."""
    D, FF, S = PROJ_DIM, FEED_FORWARD, SEQ_LEN
    n = batch * S
    out_rows = max(8, _round_up(batch, 8))

    # --- weight slab --------------------------------------------------------
    wslab = jnp.zeros((W_ROWS, LANE), jnp.float32)
    wslab = wslab.at[W_PROJ:W_PROJ + NUM_CHANNELS, 0:D].set(params["proj_w"])
    for l in range(NUM_LAYERS):
        b0 = W_LAYER0 + l * W_LAYER_STRIDE
        wslab = wslab.at[b0 + W_QKV:b0 + W_QKV + D, 0:3 * D].set(params["wqkv"][l])
        wslab = wslab.at[b0 + W_O:b0 + W_O + D, 0:D].set(params["wo"][l])
        wslab = wslab.at[b0 + W_FF1:b0 + W_FF1 + D, 0:FF].set(params["w1"][l])
        wslab = wslab.at[b0 + W_FF2:b0 + W_FF2 + FF, 0:D].set(params["w2"][l])

    # --- vector slab --------------------------------------------------------
    lay = _v_layout(n, out_rows)
    vslab = jnp.zeros((lay["rows"], LANE), jnp.float32)

    # proj bias + positional encoding, pre-tiled over the batch
    pbpe = jnp.tile(params["pe"], (batch, 1)) + params["proj_b"]
    vslab = vslab.at[0:n, 0:D].set(pbpe)

    # block-diagonal additive attention bias (keeps batches independent)
    seg = jnp.repeat(jnp.arange(batch), S)
    bias = jnp.where(seg[:, None] == seg[None, :], 0.0, NEG_INF)
    vslab = vslab.at[lay["mask"]:lay["mask"] + n, 0:n].set(
        bias.astype(jnp.float32))

    for l in range(NUM_LAYERS):
        b0 = lay["layer"] + l * 8
        vslab = vslab.at[b0 + 0, 0:3 * D].set(params["bqkv"][l, 0])
        vslab = vslab.at[b0 + 1, 0:D].set(params["bo"][l, 0])
        vslab = vslab.at[b0 + 2, 0:D].set(params["ln1g"][l, 0])
        vslab = vslab.at[b0 + 3, 0:D].set(params["ln1b"][l, 0])
        vslab = vslab.at[b0 + 4, 0:FF].set(params["b1"][l, 0])
        vslab = vslab.at[b0 + 5, 0:D].set(params["b2"][l, 0])
        vslab = vslab.at[b0 + 6, 0:D].set(params["ln2g"][l, 0])
        vslab = vslab.at[b0 + 7, 0:D].set(params["ln2b"][l, 0])

    vslab = vslab.at[lay["lng"], 0:D].set(params["lng"][0])
    vslab = vslab.at[lay["lnb"], 0:D].set(params["lnb"][0])

    # eval-mode BatchNorm folded into the head Linear
    bn_scale = params["bng"][0] * jax.lax.rsqrt(params["rv"][0] + BN_EPS)
    bn_shift = params["bnb"][0] - params["rm"][0] * bn_scale
    hw_eff = bn_scale[:, None] * params["hw"]                     # [S, NC]
    hb_eff = bn_shift @ params["hw"] + params["hb"][0]            # [NC]
    vslab = vslab.at[lay["hb"], 0:NUM_CLASSES].set(hb_eff)

    # selector (picks each batch's S rows; rows >= batch stay zero) + head wt
    rows = jnp.arange(out_rows)
    sel = (rows[:, None] == seg[None, :]).astype(jnp.float32)     # [out_rows, n]
    vslab = vslab.at[lay["sel"]:lay["sel"] + out_rows, 0:n].set(sel)
    hw_rep = jnp.tile(hw_eff, (batch, 1))                         # [n, NC]
    vslab = vslab.at[lay["hwrep"]:lay["hwrep"] + n, 0:NUM_CLASSES].set(hw_rep)

    return {"wslab": wslab, "vslab": vslab}


# ---- wrapper ----------------------------------------------------------------
@jax.jit
def haptr_forward(x, wslab, vslab):
    """x: [B, S, C] float32 -> (logits [B, num_classes], {})."""
    B, S, C = x.shape
    n = B * S
    out_rows = max(8, _round_up(B, 8))
    logits = pl.pallas_call(
        haptr_kernel,
        out_shape=jax.ShapeDtypeStruct((out_rows, LANE), jnp.float32),
    )(x.reshape(n, C), wslab, vslab)
    return logits[:B, :NUM_CLASSES], {}


if __name__ == "__main__":
    key = jax.random.PRNGKey(0)
    pkey, xkey = jax.random.split(key)
    params = init_params(pkey)
    packed = pack_params(params, BATCH)          # one-time, outside the hot path
    x = jax.random.normal(xkey, (BATCH, SEQ_LEN, NUM_CHANNELS), dtype=jnp.float32)

    logits, _ = haptr_forward(x, packed["wslab"], packed["vslab"])
    jax.block_until_ready(logits)
    assert logits.shape == (BATCH, NUM_CLASSES)
    assert bool(jnp.all(jnp.isfinite(logits)))
    print("KERNEL_OK")
</pallas_src>

<mosaic_0001>
module attributes {stable_mosaic.version = 11 : i64} {
  func.func @haptr_kernel(%arg0: memref<16x6xf32, #tpu.memory_space<vmem>>, %arg1: memref<328x128xf32, #tpu.memory_space<vmem>>, %arg2: memref<80x128xf32, #tpu.memory_space<vmem>>, %arg3: memref<8x128xf32, #tpu.memory_space<vmem>>) attributes {dimension_semantics = [], scalar_prefetch = 0 : i64, scratch_operands = 0 : i64, tpu.core_type = #tpu.core_type<tc>} {
    %c0 = arith.constant 0 : index
    %c0_0 = arith.constant 0 : index
    %0 = vector.load %arg0[%c0, %c0_0] : memref<16x6xf32, #tpu.memory_space<vmem>>, vector<16x6xf32>
    %c0_1 = arith.constant 0 : index
    %c0_2 = arith.constant 0 : index
    %1 = vector.load %arg1[%c0_1, %c0_2] : memref<328x128xf32, #tpu.memory_space<vmem>>, vector<6x32xf32>
    %cst = arith.constant dense<0.000000e+00> : vector<16x32xf32>
    %2 = tpu.matmul %0, %1, %cst {dimension_numbers = #tpu.dot_dimension_numbers<[1], [0], [0], [1], [0, 0, 1, 1], [], []>} : vector<16x6xf32>, vector<6x32xf32>, vector<16x32xf32> -> vector<16x32xf32>
    %c0_3 = arith.constant 0 : index
    %c0_4 = arith.constant 0 : index
    %3 = vector.load %arg2[%c0_3, %c0_4] : memref<80x128xf32, #tpu.memory_space<vmem>>, vector<16x32xf32>
    %4 = arith.addf %2, %3 : vector<16x32xf32>
    %c16 = arith.constant 16 : index
    %c0_5 = arith.constant 0 : index
    %5 = vector.load %arg2[%c16, %c0_5] : memref<80x128xf32, #tpu.memory_space<vmem>>, vector<16x16xf32>
    %6 = vector.shape_cast %5 : vector<16x16xf32> to vector<1x16x16xf32>
    %c8 = arith.constant 8 : index
    %c0_6 = arith.constant 0 : index
    %7 = vector.load %arg1[%c8, %c0_6] : memref<328x128xf32, #tpu.memory_space<vmem>>, vector<32x96xf32>
    %cst_7 = arith.constant dense<0.000000e+00> : vector<16x96xf32>
    %8 = tpu.matmul %4, %7, %cst_7 {dimension_numbers = #tpu.dot_dimension_numbers<[1], [0], [0], [1], [0, 0, 1, 1], [], []>} : vector<16x32xf32>, vector<32x96xf32>, vector<16x96xf32> -> vector<16x96xf32>
    %c32 = arith.constant 32 : index
    %c0_8 = arith.constant 0 : index
    %9 = vector.load %arg2[%c32, %c0_8] : memref<80x128xf32, #tpu.memory_space<vmem>>, vector<1x96xf32>
    %10 = vector.broadcast %9 : vector<1x96xf32> to vector<16x96xf32>
    %11 = arith.addf %8, %10 : vector<16x96xf32>
    %12 = tpu.transpose %11, [1, 0] : vector<16x96xf32> -> vector<96x16xf32>
    %13 = vector.shape_cast %12 : vector<96x16xf32> to vector<12x8x16xf32>
    %14 = tpu.transpose %13, [0, 2, 1] : vector<12x8x16xf32> -> vector<12x16x8xf32>
    %15 = vector.extract_strided_slice %14 {offsets = [0, 0, 0], sizes = [4, 16, 8], strides = [1, 1, 1]} : vector<12x16x8xf32> to vector<4x16x8xf32>
    %16 = vector.extract_strided_slice %14 {offsets = [4, 0, 0], sizes = [4, 16, 8], strides = [1, 1, 1]} : vector<12x16x8xf32> to vector<4x16x8xf32>
    %17 = vector.extract_strided_slice %14 {offsets = [8, 0, 0], sizes = [4, 16, 8], strides = [1, 1, 1]} : vector<12x16x8xf32> to vector<4x16x8xf32>
    "tpu.trace_start"() <{level = 10 : i32, message = "hqd,hkd->hqk"}> : () -> ()
    %cst_9 = arith.constant dense<0.000000e+00> : vector<4x16x16xf32>
    %18 = tpu.matmul %15, %16, %cst_9 {dimension_numbers = #tpu.dot_dimension_numbers<[2], [2], [1], [1], [0, 0, 0, 1, 1, 1], [0], [0]>} : vector<4x16x8xf32>, vector<4x16x8xf32>, vector<4x16x16xf32> -> vector<4x16x16xf32>
    "tpu.trace_stop"() : () -> ()
    %cst_10 = arith.constant 0.353553385 : f32
    %19 = vector.broadcast %cst_10 : f32 to vector<4x16x16xf32>
    %20 = arith.mulf %18, %19 : vector<4x16x16xf32>
    %21 = vector.broadcast %6 : vector<1x16x16xf32> to vector<4x16x16xf32>
    %22 = arith.addf %20, %21 : vector<4x16x16xf32>
    %cst_11 = arith.constant dense<0xFF800000> : vector<4x16xf32>
    %23 = vector.multi_reduction <maximumf>, %22, %cst_11 [2] : vector<4x16x16xf32> to vector<4x16xf32>
    %24 = vector.shape_cast %23 : vector<4x16xf32> to vector<4x16x1xf32>
    %25 = vector.broadcast %24 : vector<4x16x1xf32> to vector<4x16x16xf32>
    %26 = arith.subf %22, %25 : vector<4x16x16xf32>
    %27 = math.exp %26 : vector<4x16x16xf32>
    %cst_12 = arith.constant dense<0.000000e+00> : vector<4x16xf32>
    %28 = vector.multi_reduction <add>, %27, %cst_12 [2] : vector<4x16x16xf32> to vector<4x16xf32>
    %29 = vector.shape_cast %28 : vector<4x16xf32> to vector<4x16x1xf32>
    %30 = tpu.reciprocal %29 {approx = true} : vector<4x16x1xf32> -> vector<4x16x1xf32>
    %31 = vector.broadcast %30 : vector<4x16x1xf32> to vector<4x16x16xf32>
    %32 = arith.mulf %27, %31 : vector<4x16x16xf32>
    "tpu.trace_start"() <{level = 10 : i32, message = "hqk,hkd->hqd"}> : () -> ()
    %cst_13 = arith.constant dense<0.000000e+00> : vector<4x16x8xf32>
    %33 = tpu.matmul %32, %17, %cst_13 {dimension_numbers = #tpu.dot_dimension_numbers<[2], [1], [1], [2], [0, 0, 0, 1, 1, 2], [0], [0]>} : vector<4x16x16xf32>, vector<4x16x8xf32>, vector<4x16x8xf32> -> vector<4x16x8xf32>
    "tpu.trace_stop"() : () -> ()
    %34 = tpu.transpose %33, [0, 2, 1] : vector<4x16x8xf32> -> vector<4x8x16xf32>
    %35 = vector.shape_cast %34 : vector<4x8x16xf32> to vector<32x16xf32>
    %36 = tpu.transpose %35, [1, 0] : vector<32x16xf32> -> vector<16x32xf32>
    %c40 = arith.constant 40 : index
    %c0_14 = arith.constant 0 : index
    %37 = vector.load %arg1[%c40, %c0_14] : memref<328x128xf32, #tpu.memory_space<vmem>>, vector<32x32xf32>
    %cst_15 = arith.constant dense<0.000000e+00> : vector<16x32xf32>
    %38 = tpu.matmul %36, %37, %cst_15 {dimension_numbers = #tpu.dot_dimension_numbers<[1], [0], [0], [1], [0, 0, 1, 1], [], []>} : vector<16x32xf32>, vector<32x32xf32>, vector<16x32xf32> -> vector<16x32xf32>
    %c33 = arith.constant 33 : index
    %c0_16 = arith.constant 0 : index
    %39 = vector.load %arg2[%c33, %c0_16] : memref<80x128xf32, #tpu.memory_space<vmem>>, vector<1x32xf32>
    %40 = vector.broadcast %39 : vector<1x32xf32> to vector<16x32xf32>
    %41 = arith.addf %38, %40 : vector<16x32xf32>
    %42 = arith.addf %4, %41 : vector<16x32xf32>
    %c34 = arith.constant 34 : index
    %c0_17 = arith.constant 0 : index
    %43 = vector.load %arg2[%c34, %c0_17] : memref<80x128xf32, #tpu.memory_space<vmem>>, vector<1x32xf32>
    %c35 = arith.constant 35 : index
    %c0_18 = arith.constant 0 : index
    %44 = vector.load %arg2[%c35, %c0_18] : memref<80x128xf32, #tpu.memory_space<vmem>>, vector<1x32xf32>
    %cst_19 = arith.constant dense<0.000000e+00> : vector<16xf32>
    %45 = vector.multi_reduction <add>, %42, %cst_19 [1] : vector<16x32xf32> to vector<16xf32>
    %46 = vector.shape_cast %45 : vector<16xf32> to vector<16x1xf32>
    %cst_20 = arith.constant 3.200000e+01 : f32
    %47 = vector.broadcast %cst_20 : f32 to vector<16x1xf32>
    %48 = arith.divf %46, %47 : vector<16x1xf32>
    %49 = vector.broadcast %48 : vector<16x1xf32> to vector<16x32xf32>
    %50 = arith.subf %42, %49 : vector<16x32xf32>
    %51 = arith.mulf %50, %50 : vector<16x32xf32>
    %cst_21 = arith.constant dense<0.000000e+00> : vector<16xf32>
    %52 = vector.multi_reduction <add>, %51, %cst_21 [1] : vector<16x32xf32> to vector<16xf32>
    %53 = vector.shape_cast %52 : vector<16xf32> to vector<16x1xf32>
    %cst_22 = arith.constant 3.200000e+01 : f32
    %54 = vector.broadcast %cst_22 : f32 to vector<16x1xf32>
    %55 = arith.divf %53, %54 : vector<16x1xf32>
    %56 = vector.broadcast %48 : vector<16x1xf32> to vector<16x32xf32>
    %57 = arith.subf %42, %56 : vector<16x32xf32>
    %cst_23 = arith.constant 9.99999974E-6 : f32
    %58 = vector.broadcast %cst_23 : f32 to vector<16x1xf32>
    %59 = arith.addf %55, %58 : vector<16x1xf32>
    %60 = math.rsqrt %59 : vector<16x1xf32>
    %61 = vector.broadcast %60 : vector<16x1xf32> to vector<16x32xf32>
    %62 = arith.mulf %57, %61 : vector<16x32xf32>
    %63 = vector.broadcast %43 : vector<1x32xf32> to vector<16x32xf32>
    %64 = arith.mulf %62, %63 : vector<16x32xf32>
    %65 = vector.broadcast %44 : vector<1x32xf32> to vector<16x32xf32>
    %66 = arith.addf %64, %65 : vector<16x32xf32>
    %c72 = arith.constant 72 : index
    %c0_24 = arith.constant 0 : index
    %67 = vector.load %arg1[%c72, %c0_24] : memref<328x128xf32, #tpu.memory_space<vmem>>, vector<32x64xf32>
    %cst_25 = arith.constant dense<0.000000e+00> : vector<16x64xf32>
    %68 = tpu.matmul %66, %67, %cst_25 {dimension_numbers = #tpu.dot_dimension_numbers<[1], [0], [0], [1], [0, 0, 1, 1], [], []>} : vector<16x32xf32>, vector<32x64xf32>, vector<16x64xf32> -> vector<16x64xf32>
    %c36 = arith.constant 36 : index
    %c0_26 = arith.constant 0 : index
    %69 = vector.load %arg2[%c36, %c0_26] : memref<80x128xf32, #tpu.memory_space<vmem>>, vector<1x64xf32>
    %70 = vector.broadcast %69 : vector<1x64xf32> to vector<16x64xf32>
    %71 = arith.addf %68, %70 : vector<16x64xf32>
    %72 = arith.mulf %71, %71 : vector<16x64xf32>
    %73 = arith.mulf %71, %72 : vector<16x64xf32>
    %cst_27 = arith.constant 4.471500e-02 : f32
    %74 = vector.broadcast %cst_27 : f32 to vector<16x64xf32>
    %75 = arith.mulf %74, %73 : vector<16x64xf32>
    %76 = arith.addf %71, %75 : vector<16x64xf32>
    %cst_28 = arith.constant 0.797884583 : f32
    %77 = vector.broadcast %cst_28 : f32 to vector<16x64xf32>
    %78 = arith.mulf %77, %76 : vector<16x64xf32>
    %79 = math.tanh %78 : vector<16x64xf32>
    %cst_29 = arith.constant 1.000000e+00 : f32
    %80 = vector.broadcast %cst_29 : f32 to vector<16x64xf32>
    %81 = arith.addf %80, %79 : vector<16x64xf32>
    %cst_30 = arith.constant 5.000000e-01 : f32
    %82 = vector.broadcast %cst_30 : f32 to vector<16x64xf32>
    %83 = arith.mulf %82, %81 : vector<16x64xf32>
    %84 = arith.mulf %71, %83 : vector<16x64xf32>
    %c104 = arith.constant 104 : index
    %c0_31 = arith.constant 0 : index
    %85 = vector.load %arg1[%c104, %c0_31] : memref<328x128xf32, #tpu.memory_space<vmem>>, vector<64x32xf32>
    %cst_32 = arith.constant dense<0.000000e+00> : vector<16x32xf32>
    %86 = tpu.matmul %84, %85, %cst_32 {dimension_numbers = #tpu.dot_dimension_numbers<[1], [0], [0], [1], [0, 0, 1, 1], [], []>} : vector<16x64xf32>, vector<64x32xf32>, vector<16x32xf32> -> vector<16x32xf32>
    %c37 = arith.constant 37 : index
    %c0_33 = arith.constant 0 : index
    %87 = vector.load %arg2[%c37, %c0_33] : memref<80x128xf32, #tpu.memory_space<vmem>>, vector<1x32xf32>
    %88 = vector.broadcast %87 : vector<1x32xf32> to vector<16x32xf32>
    %89 = arith.addf %86, %88 : vector<16x32xf32>
    %90 = arith.addf %66, %89 : vector<16x32xf32>
    %c38 = arith.constant 38 : index
    %c0_34 = arith.constant 0 : index
    %91 = vector.load %arg2[%c38, %c0_34] : memref<80x128xf32, #tpu.memory_space<vmem>>, vector<1x32xf32>
    %c39 = arith.constant 39 : index
    %c0_35 = arith.constant 0 : index
    %92 = vector.load %arg2[%c39, %c0_35] : memref<80x128xf32, #tpu.memory_space<vmem>>, vector<1x32xf32>
    %cst_36 = arith.constant dense<0.000000e+00> : vector<16xf32>
    %93 = vector.multi_reduction <add>, %90, %cst_36 [1] : vector<16x32xf32> to vector<16xf32>
    %94 = vector.shape_cast %93 : vector<16xf32> to vector<16x1xf32>
    %cst_37 = arith.constant 3.200000e+01 : f32
    %95 = vector.broadcast %cst_37 : f32 to vector<16x1xf32>
    %96 = arith.divf %94, %95 : vector<16x1xf32>
    %97 = vector.broadcast %96 : vector<16x1xf32> to vector<16x32xf32>
    %98 = arith.subf %90, %97 : vector<16x32xf32>
    %99 = arith.mulf %98, %98 : vector<16x32xf32>
    %cst_38 = arith.constant dense<0.000000e+00> : vector<16xf32>
    %100 = vector.multi_reduction <add>, %99, %cst_38 [1] : vector<16x32xf32> to vector<16xf32>
    %101 = vector.shape_cast %100 : vector<16xf32> to vector<16x1xf32>
    %cst_39 = arith.constant 3.200000e+01 : f32
    %102 = vector.broadcast %cst_39 : f32 to vector<16x1xf32>
    %103 = arith.divf %101, %102 : vector<16x1xf32>
    %104 = vector.broadcast %96 : vector<16x1xf32> to vector<16x32xf32>
    %105 = arith.subf %90, %104 : vector<16x32xf32>
    %cst_40 = arith.constant 9.99999974E-6 : f32
    %106 = vector.broadcast %cst_40 : f32 to vector<16x1xf32>
    %107 = arith.addf %103, %106 : vector<16x1xf32>
    %108 = math.rsqrt %107 : vector<16x1xf32>
    %109 = vector.broadcast %108 : vector<16x1xf32> to vector<16x32xf32>
    %110 = arith.mulf %105, %109 : vector<16x32xf32>
    %111 = vector.broadcast %91 : vector<1x32xf32> to vector<16x32xf32>
    %112 = arith.mulf %110, %111 : vector<16x32xf32>
    %113 = vector.broadcast %92 : vector<1x32xf32> to vector<16x32xf32>
    %114 = arith.addf %112, %113 : vector<16x32xf32>
    %c168 = arith.constant 168 : index
    %c0_41 = arith.constant 0 : index
    %115 = vector.load %arg1[%c168, %c0_41] : memref<328x128xf32, #tpu.memory_space<vmem>>, vector<32x96xf32>
    %cst_42 = arith.constant dense<0.000000e+00> : vector<16x96xf32>
    %116 = tpu.matmul %114, %115, %cst_42 {dimension_numbers = #tpu.dot_dimension_numbers<[1], [0], [0], [1], [0, 0, 1, 1], [], []>} : vector<16x32xf32>, vector<32x96xf32>, vector<16x96xf32> -> vector<16x96xf32>
    %c40_43 = arith.constant 40 : index
    %c0_44 = arith.constant 0 : index
    %117 = vector.load %arg2[%c40_43, %c0_44] : memref<80x128xf32, #tpu.memory_space<vmem>>, vector<1x96xf32>
    %118 = vector.broadcast %117 : vector<1x96xf32> to vector<16x96xf32>
    %119 = arith.addf %116, %118 : vector<16x96xf32>
    %120 = tpu.transpose %119, [1, 0] : vector<16x96xf32> -> vector<96x16xf32>
    %121 = vector.shape_cast %120 : vector<96x16xf32> to vector<12x8x16xf32>
    %122 = tpu.transpose %121, [0, 2, 1] : vector<12x8x16xf32> -> vector<12x16x8xf32>
    %123 = vector.extract_strided_slice %122 {offsets = [0, 0, 0], sizes = [4, 16, 8], strides = [1, 1, 1]} : vector<12x16x8xf32> to vector<4x16x8xf32>
    %124 = vector.extract_strided_slice %122 {offsets = [4, 0, 0], sizes = [4, 16, 8], strides = [1, 1, 1]} : vector<12x16x8xf32> to vector<4x16x8xf32>
    %125 = vector.extract_strided_slice %122 {offsets = [8, 0, 0], sizes = [4, 16, 8], strides = [1, 1, 1]} : vector<12x16x8xf32> to vector<4x16x8xf32>
    "tpu.trace_start"() <{level = 10 : i32, message = "hqd,hkd->hqk"}> : () -> ()
    %cst_45 = arith.constant dense<0.000000e+00> : vector<4x16x16xf32>
    %126 = tpu.matmul %123, %124, %cst_45 {dimension_numbers = #tpu.dot_dimension_numbers<[2], [2], [1], [1], [0, 0, 0, 1, 1, 1], [0], [0]>} : vector<4x16x8xf32>, vector<4x16x8xf32>, vector<4x16x16xf32> -> vector<4x16x16xf32>
    "tpu.trace_stop"() : () -> ()
    %cst_46 = arith.constant 0.353553385 : f32
    %127 = vector.broadcast %cst_46 : f32 to vector<4x16x16xf32>
    %128 = arith.mulf %126, %127 : vector<4x16x16xf32>
    %129 = vector.broadcast %6 : vector<1x16x16xf32> to vector<4x16x16xf32>
    %130 = arith.addf %128, %129 : vector<4x16x16xf32>
    %cst_47 = arith.constant dense<0xFF800000> : vector<4x16xf32>
    %131 = vector.multi_reduction <maximumf>, %130, %cst_47 [2] : vector<4x16x16xf32> to vector<4x16xf32>
    %132 = vector.shape_cast %131 : vector<4x16xf32> to vector<4x16x1xf32>
    %133 = vector.broadcast %132 : vector<4x16x1xf32> to vector<4x16x16xf32>
    %134 = arith.subf %130, %133 : vector<4x16x16xf32>
    %135 = math.exp %134 : vector<4x16x16xf32>
    %cst_48 = arith.constant dense<0.000000e+00> : vector<4x16xf32>
    %136 = vector.multi_reduction <add>, %135, %cst_48 [2] : vector<4x16x16xf32> to vector<4x16xf32>
    %137 = vector.shape_cast %136 : vector<4x16xf32> to vector<4x16x1xf32>
    %138 = tpu.reciprocal %137 {approx = true} : vector<4x16x1xf32> -> vector<4x16x1xf32>
    %139 = vector.broadcast %138 : vector<4x16x1xf32> to vector<4x16x16xf32>
    %140 = arith.mulf %135, %139 : vector<4x16x16xf32>
    "tpu.trace_start"() <{level = 10 : i32, message = "hqk,hkd->hqd"}> : () -> ()
    %cst_49 = arith.constant dense<0.000000e+00> : vector<4x16x8xf32>
    %141 = tpu.matmul %140, %125, %cst_49 {dimension_numbers = #tpu.dot_dimension_numbers<[2], [1], [1], [2], [0, 0, 0, 1, 1, 2], [0], [0]>} : vector<4x16x16xf32>, vector<4x16x8xf32>, vector<4x16x8xf32> -> vector<4x16x8xf32>
    "tpu.trace_stop"() : () -> ()
    %142 = tpu.transpose %141, [0, 2, 1] : vector<4x16x8xf32> -> vector<4x8x16xf32>
    %143 = vector.shape_cast %142 : vector<4x8x16xf32> to vector<32x16xf32>
    %144 = tpu.transpose %143, [1, 0] : vector<32x16xf32> -> vector<16x32xf32>
    %c200 = arith.constant 200 : index
    %c0_50 = arith.constant 0 : index
    %145 = vector.load %arg1[%c200, %c0_50] : memref<328x128xf32, #tpu.memory_space<vmem>>, vector<32x32xf32>
    %cst_51 = arith.constant dense<0.000000e+00> : vector<16x32xf32>
    %146 = tpu.matmul %144, %145, %cst_51 {dimension_numbers = #tpu.dot_dimension_numbers<[1], [0], [0], [1], [0, 0, 1, 1], [], []>} : vector<16x32xf32>, vector<32x32xf32>, vector<16x32xf32> -> vector<16x32xf32>
    %c41 = arith.constant 41 : index
    %c0_52 = arith.constant 0 : index
    %147 = vector.load %arg2[%c41, %c0_52] : memref<80x128xf32, #tpu.memory_space<vmem>>, vector<1x32xf32>
    %148 = vector.broadcast %147 : vector<1x32xf32> to vector<16x32xf32>
    %149 = arith.addf %146, %148 : vector<16x32xf32>
    %150 = arith.addf %114, %149 : vector<16x32xf32>
    %c42 = arith.constant 42 : index
    %c0_53 = arith.constant 0 : index
    %151 = vector.load %arg2[%c42, %c0_53] : memref<80x128xf32, #tpu.memory_space<vmem>>, vector<1x32xf32>
    %c43 = arith.constant 43 : index
    %c0_54 = arith.constant 0 : index
    %152 = vector.load %arg2[%c43, %c0_54] : memref<80x128xf32, #tpu.memory_space<vmem>>, vector<1x32xf32>
    %cst_55 = arith.constant dense<0.000000e+00> : vector<16xf32>
    %153 = vector.multi_reduction <add>, %150, %cst_55 [1] : vector<16x32xf32> to vector<16xf32>
    %154 = vector.shape_cast %153 : vector<16xf32> to vector<16x1xf32>
    %cst_56 = arith.constant 3.200000e+01 : f32
    %155 = vector.broadcast %cst_56 : f32 to vector<16x1xf32>
    %156 = arith.divf %154, %155 : vector<16x1xf32>
    %157 = vector.broadcast %156 : vector<16x1xf32> to vector<16x32xf32>
    %158 = arith.subf %150, %157 : vector<16x32xf32>
    %159 = arith.mulf %158, %158 : vector<16x32xf32>
    %cst_57 = arith.constant dense<0.000000e+00> : vector<16xf32>
    %160 = vector.multi_reduction <add>, %159, %cst_57 [1] : vector<16x32xf32> to vector<16xf32>
    %161 = vector.shape_cast %160 : vector<16xf32> to vector<16x1xf32>
    %cst_58 = arith.constant 3.200000e+01 : f32
    %162 = vector.broadcast %cst_58 : f32 to vector<16x1xf32>
    %163 = arith.divf %161, %162 : vector<16x1xf32>
    %164 = vector.broadcast %156 : vector<16x1xf32> to vector<16x32xf32>
    %165 = arith.subf %150, %164 : vector<16x32xf32>
    %cst_59 = arith.constant 9.99999974E-6 : f32
    %166 = vector.broadcast %cst_59 : f32 to vector<16x1xf32>
    %167 = arith.addf %163, %166 : vector<16x1xf32>
    %168 = math.rsqrt %167 : vector<16x1xf32>
    %169 = vector.broadcast %168 : vector<16x1xf32> to vector<16x32xf32>
    %170 = arith.mulf %165, %169 : vector<16x32xf32>
    %171 = vector.broadcast %151 : vector<1x32xf32> to vector<16x32xf32>
    %172 = arith.mulf %170, %171 : vector<16x32xf32>
    %173 = vector.broadcast %152 : vector<1x32xf32> to vector<16x32xf32>
    %174 = arith.addf %172, %173 : vector<16x32xf32>
    %c232 = arith.constant 232 : index
    %c0_60 = arith.constant 0 : index
    %175 = vector.load %arg1[%c232, %c0_60] : memref<328x128xf32, #tpu.memory_space<vmem>>, vector<32x64xf32>
    %cst_61 = arith.constant dense<0.000000e+00> : vector<16x64xf32>
    %176 = tpu.matmul %174, %175, %cst_61 {dimension_numbers = #tpu.dot_dimension_numbers<[1], [0], [0], [1], [0, 0, 1, 1], [], []>} : vector<16x32xf32>, vector<32x64xf32>, vector<16x64xf32> -> vector<16x64xf32>
    %c44 = arith.constant 44 : index
    %c0_62 = arith.constant 0 : index
    %177 = vector.load %arg2[%c44, %c0_62] : memref<80x128xf32, #tpu.memory_space<vmem>>, vector<1x64xf32>
    %178 = vector.broadcast %177 : vector<1x64xf32> to vector<16x64xf32>
    %179 = arith.addf %176, %178 : vector<16x64xf32>
    %180 = arith.mulf %179, %179 : vector<16x64xf32>
    %181 = arith.mulf %179, %180 : vector<16x64xf32>
    %cst_63 = arith.constant 4.471500e-02 : f32
    %182 = vector.broadcast %cst_63 : f32 to vector<16x64xf32>
    %183 = arith.mulf %182, %181 : vector<16x64xf32>
    %184 = arith.addf %179, %183 : vector<16x64xf32>
    %cst_64 = arith.constant 0.797884583 : f32
    %185 = vector.broadcast %cst_64 : f32 to vector<16x64xf32>
    %186 = arith.mulf %185, %184 : vector<16x64xf32>
    %187 = math.tanh %186 : vector<16x64xf32>
    %cst_65 = arith.constant 1.000000e+00 : f32
    %188 = vector.broadcast %cst_65 : f32 to vector<16x64xf32>
    %189 = arith.addf %188, %187 : vector<16x64xf32>
    %cst_66 = arith.constant 5.000000e-01 : f32
    %190 = vector.broadcast %cst_66 : f32 to vector<16x64xf32>
    %191 = arith.mulf %190, %189 : vector<16x64xf32>
    %192 = arith.mulf %179, %191 : vector<16x64xf32>
    %c264 = arith.constant 264 : index
    %c0_67 = arith.constant 0 : index
    %193 = vector.load %arg1[%c264, %c0_67] : memref<328x128xf32, #tpu.memory_space<vmem>>, vector<64x32xf32>
    %cst_68 = arith.constant dense<0.000000e+00> : vector<16x32xf32>
    %194 = tpu.matmul %192, %193, %cst_68 {dimension_numbers = #tpu.dot_dimension_numbers<[1], [0], [0], [1], [0, 0, 1, 1], [], []>} : vector<16x64xf32>, vector<64x32xf32>, vector<16x32xf32> -> vector<16x32xf32>
    %c45 = arith.constant 45 : index
    %c0_69 = arith.constant 0 : index
    %195 = vector.load %arg2[%c45, %c0_69] : memref<80x128xf32, #tpu.memory_space<vmem>>, vector<1x32xf32>
    %196 = vector.broadcast %195 : vector<1x32xf32> to vector<16x32xf32>
    %197 = arith.addf %194, %196 : vector<16x32xf32>
    %198 = arith.addf %174, %197 : vector<16x32xf32>
    %c46 = arith.constant 46 : index
    %c0_70 = arith.constant 0 : index
    %199 = vector.load %arg2[%c46, %c0_70] : memref<80x128xf32, #tpu.memory_space<vmem>>, vector<1x32xf32>
    %c47 = arith.constant 47 : index
    %c0_71 = arith.constant 0 : index
    %200 = vector.load %arg2[%c47, %c0_71] : memref<80x128xf32, #tpu.memory_space<vmem>>, vector<1x32xf32>
    %cst_72 = arith.constant dense<0.000000e+00> : vector<16xf32>
    %201 = vector.multi_reduction <add>, %198, %cst_72 [1] : vector<16x32xf32> to vector<16xf32>
    %202 = vector.shape_cast %201 : vector<16xf32> to vector<16x1xf32>
    %cst_73 = arith.constant 3.200000e+01 : f32
    %203 = vector.broadcast %cst_73 : f32 to vector<16x1xf32>
    %204 = arith.divf %202, %203 : vector<16x1xf32>
    %205 = vector.broadcast %204 : vector<16x1xf32> to vector<16x32xf32>
    %206 = arith.subf %198, %205 : vector<16x32xf32>
    %207 = arith.mulf %206, %206 : vector<16x32xf32>
    %cst_74 = arith.constant dense<0.000000e+00> : vector<16xf32>
    %208 = vector.multi_reduction <add>, %207, %cst_74 [1] : vector<16x32xf32> to vector<16xf32>
    %209 = vector.shape_cast %208 : vector<16xf32> to vector<16x1xf32>
    %cst_75 = arith.constant 3.200000e+01 : f32
    %210 = vector.broadcast %cst_75 : f32 to vector<16x1xf32>
    %211 = arith.divf %209, %210 : vector<16x1xf32>
    %212 = vector.broadcast %204 : vector<16x1xf32> to vector<16x32xf32>
    %213 = arith.subf %198, %212 : vector<16x32xf32>
    %cst_76 = arith.constant 9.99999974E-6 : f32
    %214 = vector.broadcast %cst_76 : f32 to vector<16x1xf32>
    %215 = arith.addf %211, %214 : vector<16x1xf32>
    %216 = math.rsqrt %215 : vector<16x1xf32>
    %217 = vector.broadcast %216 : vector<16x1xf32> to vector<16x32xf32>
    %218 = arith.mulf %213, %217 : vector<16x32xf32>
    %219 = vector.broadcast %199 : vector<1x32xf32> to vector<16x32xf32>
    %220 = arith.mulf %218, %219 : vector<16x32xf32>
    %221 = vector.broadcast %200 : vector<1x32xf32> to vector<16x32xf32>
    %222 = arith.addf %220, %221 : vector<16x32xf32>
    %c48 = arith.constant 48 : index
    %c0_77 = arith.constant 0 : index
    %223 = vector.load %arg2[%c48, %c0_77] : memref<80x128xf32, #tpu.memory_space<vmem>>, vector<1x32xf32>
    %c49 = arith.constant 49 : index
    %c0_78 = arith.constant 0 : index
    %224 = vector.load %arg2[%c49, %c0_78] : memref<80x128xf32, #tpu.memory_space<vmem>>, vector<1x32xf32>
    %cst_79 = arith.constant dense<0.000000e+00> : vector<16xf32>
    %225 = vector.multi_reduction <add>, %222, %cst_79 [1] : vector<16x32xf32> to vector<16xf32>
    %226 = vector.shape_cast %225 : vector<16xf32> to vector<16x1xf32>
    %cst_80 = arith.constant 3.200000e+01 : f32
    %227 = vector.broadcast %cst_80 : f32 to vector<16x1xf32>
    %228 = arith.divf %226, %227 : vector<16x1xf32>
    %229 = vector.broadcast %228 : vector<16x1xf32> to vector<16x32xf32>
    %230 = arith.subf %222, %229 : vector<16x32xf32>
    %231 = arith.mulf %230, %230 : vector<16x32xf32>
    %cst_81 = arith.constant dense<0.000000e+00> : vector<16xf32>
    %232 = vector.multi_reduction <add>, %231, %cst_81 [1] : vector<16x32xf32> to vector<16xf32>
    %233 = vector.shape_cast %232 : vector<16xf32> to vector<16x1xf32>
    %cst_82 = arith.constant 3.200000e+01 : f32
    %234 = vector.broadcast %cst_82 : f32 to vector<16x1xf32>
    %235 = arith.divf %233, %234 : vector<16x1xf32>
    %236 = vector.broadcast %228 : vector<16x1xf32> to vector<16x32xf32>
    %237 = arith.subf %222, %236 : vector<16x32xf32>
    %cst_83 = arith.constant 9.99999974E-6 : f32
    %238 = vector.broadcast %cst_83 : f32 to vector<16x1xf32>
    %239 = arith.addf %235, %238 : vector<16x1xf32>
    %240 = math.rsqrt %239 : vector<16x1xf32>
    %241 = vector.broadcast %240 : vector<16x1xf32> to vector<16x32xf32>
    %242 = arith.mulf %237, %241 : vector<16x32xf32>
    %243 = vector.broadcast %223 : vector<1x32xf32> to vector<16x32xf32>
    %244 = arith.mulf %242, %243 : vector<16x32xf32>
    %245 = vector.broadcast %224 : vector<1x32xf32> to vector<16x32xf32>
    %246 = arith.addf %244, %245 : vector<16x32xf32>
    %cst_84 = arith.constant dense<0.000000e+00> : vector<16xf32>
    %247 = vector.multi_reduction <add>, %246, %cst_84 [1] : vector<16x32xf32> to vector<16xf32>
    %248 = vector.shape_cast %247 : vector<16xf32> to vector<16x1xf32>
    %cst_85 = arith.constant 3.200000e+01 : f32
    %249 = vector.broadcast %cst_85 : f32 to vector<16x1xf32>
    %250 = arith.divf %248, %249 : vector<16x1xf32>
    %c64 = arith.constant 64 : index
    %c0_86 = arith.constant 0 : index
    %251 = vector.load %arg2[%c64, %c0_86] : memref<80x128xf32, #tpu.memory_space<vmem>>, vector<16x128xf32>
    %252 = vector.broadcast %250 : vector<16x1xf32> to vector<16x128xf32>
    %253 = arith.mulf %251, %252 : vector<16x128xf32>
    %c56 = arith.constant 56 : index
    %c0_87 = arith.constant 0 : index
    %254 = vector.load %arg2[%c56, %c0_87] : memref<80x128xf32, #tpu.memory_space<vmem>>, vector<8x16xf32>
    %cst_88 = arith.constant dense<0.000000e+00> : vector<8x128xf32>
    %255 = tpu.matmul %254, %253, %cst_88 {dimension_numbers = #tpu.dot_dimension_numbers<[1], [0], [0], [1], [0, 0, 1, 1], [], []>} : vector<8x16xf32>, vector<16x128xf32>, vector<8x128xf32> -> vector<8x128xf32>
    %c50 = arith.constant 50 : index
    %c0_89 = arith.constant 0 : index
    %256 = vector.load %arg2[%c50, %c0_89] : memref<80x128xf32, #tpu.memory_space<vmem>>, vector<1x128xf32>
    %257 = vector.broadcast %256 : vector<1x128xf32> to vector<8x128xf32>
    %258 = arith.addf %255, %257 : vector<8x128xf32>
    %c0_90 = arith.constant 0 : index
    %c0_91 = arith.constant 0 : index
    %259 = vector.load %arg3[%c0_90, %c0_91] : memref<8x128xf32, #tpu.memory_space<vmem>>, vector<8x128xf32>
    tpu.vector_store %arg3[%c0_90, %c0_91], %258 {strides = array<i32>} : memref<8x128xf32, #tpu.memory_space<vmem>>, vector<8x128xf32>,
    return
  }
}

</mosaic_0001>

<bundles_post_ra>
// kernel: haptr_forward.1
= control target key start
LH: loop header
LB: loop body
LE: loop exit
PB: predicated region body
PF: predicated region fallthrough
CT: control target
= control target key end

     0   :  { %8 = vsyncpa [#allocation3], 0  ;;  %s5021_s0 = inlined_call_operand.vmem [shape: f32[16,6], index: 0, kind: input, shape index: {}]   ;;  %s5022_s1 = inlined_call_operand.hbm [shape: f32[328,128], index: 1, kind: input, shape index: {}]   ;;  %s5023_s2 = inlined_call_operand.hbm [shape: f32[80,128], index: 2, kind: input, shape index: {}]   ;;  %s5024_s3 = inlined_call_operand.vmem [shape: f32[8,128], index: 3, kind: output, shape index: {}]  }
   0x1   :  { %9 = vsyncpa [#allocation5], 0  ;;  %s4725_s12 = smov [#allocation2]   ;;  %s4677_s16 = scalar_lea.hbm %s5022_s1, 5248 }
   0x2   :  { %s17_s13 = sshll.u32 %s4725_s12, 4  ;;  %p4678_p0 = scmp.ne.s32.totalorder %s5022_s1, %s4677_s16  ;;  %s18_s13 = int_to_ptr.vmem [resolvable:$true] %s17_s13 }
   0x3   :  { %p4681_p1 = scmp.lt.u32.totalorder %s4677_s16, %s5022_s1 }
   0x5   :  { %p4683_p2 = pnand %p4681_p1, %p4678_p0 }
   0x7   :  { %4686 = shalt.err (!%p4683_p2)
}
   0x8   :  { %s4687_s21 = scalar_lea.vmem %s18_s13, 5248  ;;  %p4692_p4 = scmp.lt.s32.totalorder %s18_s13, %s18_s13 }
   0x9   :  { %p4688_p3 = scmp.ne.s32.totalorder %s18_s13, %s4687_s21  ;;  %p4693_p5 = scmp.lt.s32.totalorder %s4687_s21, %s4687_s21 }
   0xb   :  { %p4694_p6 = por %p4693_p5, %p4692_p4 }
   0xd   :  { %p4695_p7 = pnand %p4694_p6, %p4688_p3 }
   0xf   :  { %4698 = shalt.err (!%p4695_p7)
}
  0x10   :  { %s4726_s22 = smov 128   ;;  %s4727_s23 = smov 8  }
  0x11   :  { %23 = dma.hbm_to_vmem [thread:$0]  %s5022_s1, 5248, %s18_s13, [#allocation3], %s4726_s22, %s4726_s22, %s4727_s23  }
  0x12   :  { %s4728_s26 = smov [#allocation4]   ;;  %s4699_s30 = scalar_lea.hbm %s5023_s2, 1280 }
  0x13   :  { %s29_s27 = sshll.u32 %s4728_s26, 4  ;;  %p4700_p8 = scmp.ne.s32.totalorder %s5023_s2, %s4699_s30  ;;  %s30_s27 = int_to_ptr.vmem [resolvable:$true] %s29_s27 }
  0x14   :  { %p4703_p9 = scmp.lt.u32.totalorder %s4699_s30, %s5023_s2 }
  0x16   :  { %p4705_p10 = pnand %p4703_p9, %p4700_p8 }
  0x18   :  { %4708 = shalt.err (!%p4705_p10)
}
  0x19   :  { %s4709_s8 = scalar_lea.vmem %s30_s27, 1280  ;;  %p4714_p12 = scmp.lt.s32.totalorder %s30_s27, %s30_s27 }
  0x1a   :  { %p4710_p11 = scmp.ne.s32.totalorder %s30_s27, %s4709_s8  ;;  %p4715_p13 = scmp.lt.s32.totalorder %s4709_s8, %s4709_s8 }
  0x1c   :  { %p4716_p0 = por %p4715_p13, %p4714_p12 }
  0x1e   :  { %p4717_p1 = pnand %p4716_p0, %p4710_p11 }
  0x20   :  { %4720 = shalt.err (!%p4717_p1)
}
  0x21   :  { %35 = dma.hbm_to_vmem [thread:$0]  %s5023_s2, 1280, %s30_s27, [#allocation5], %s4726_s22, %s4726_s22, %s4727_s23  }
  0x22   :  { %4721 = dma.done.wait [#allocation3], 5248  }
  0x23   :  { %4722 = vsyncadd [#allocation3], 4294962048 }
  0x24   :  { %4723 = dma.done.wait [#allocation5], 1280  }
  0x25   :  { %4724 = vsyncadd [#allocation5], 4294966016  ;;  %vm54_vm0 = vcmask 1045504   ;;  %vm47_vm1 = vcmask 48128   ;;  %v44_v0 = vld [vmem:[#allocation2] sm:$0x3f] }
  0x26   :  { %v42_v1 = vld [vmem:[%s5021_s0] sm:$0xff]  ;;  %v43_v2 = vld [vmem:[%s5021_s0 + $0x8] sm:$0xff]  ;;  %4127 = vmatprep.subr.msk.mxu0 %vm54_vm0, %v44_v0  ;;  %v136_v4 = vld [vmem:[#allocation2 + $0x10] sm:$0xff]  ;;  %vm144_vm2 = vcmask 261120   ;;  %vm642_vm3 = vcmask 64512   ;;  %vm1007_vm5 = vcmask 130048  }
  0x27   :  { %4129 = vmatprep.mubr.msk.f32.mxu0 %vm47_vm1, %v42_v1  ;;  %v135_v3 = vld [vmem:[#allocation2 + $0x8] sm:$0xff]  ;;  %4128 = vmatpush3.msk.msra.mxu0 %vm54_vm0, %v44_v0  ;;  %v137_v6 = vld [vmem:[#allocation2 + $0x18] sm:$0xff]  ;;  %v138_v7 = vld [vmem:[#allocation2 + $0x20] sm:$0xff]  ;;  %vm1834_vm6 = vcmask 523264   ;;  %vm4730_vm7 = vmmov 0  }
  0x28   :  { %v4355_v5 = vpack.c.bf16 %v136_v4, %v135_v3  ;;  %4130 = vmatmul.mubr.msk.f32.vlgmr.msra.gmra.mrb[0].mxu0 %vm47_vm1, %v43_v2  ;;  %v4359_v8 = vpack.c.bf16 %v138_v7, %v137_v6  ;;  %v45_v9 = vld [vmem:[#allocation4] sm:$0xff]  ;;  %v46_v10 = vld [vmem:[#allocation4 + $0x8] sm:$0xff]  ;;  %vm4801_vm4 = vmpackc.low %vm642_vm3, %vm642_vm3 }
  0x29   :  { %v3917_v15 = vld [vmem:[#allocation4 + $0x20] ss:$0 sm:$0xff]  ;;  %v4828_v57 = vld [vmem:[#allocation4 + $0x18] sm:$0xff]  ;;  %v4830_v61 = vld [vmem:[#allocation4 + $0x10] sm:$0xff] }
  0x2a   :  { %4356 = vmatprep.subr.bf16.mxu1 %v4355_v5 }
  0x2b   :  { %4358 = vmatpush3.bf16.msra.mxu1 %v4355_v5 }
  0x2c   :  { %4360 = vmatprep.subr.bf16.mxu1 %v4359_v8 }
  0x2f   :  { %4362 = vmatpush3.bf16.msra.mxu1 %v4359_v8 }
  0xfb   :  { %v4131_v11 = vpop.f32.mrb[0].mxu0 }
  0xfc   :  { %v124_v12 = vpop.f32.mrb[1].mxu0  ;;  %v4784_v14 = vadd.f32 %v4131_v11, %v46_v10 }
  0xfd   :  { %v4782_v13 = vadd.f32 %v124_v12, %v45_v9 }
  0xff   :  { %4140 = vmatprep.mubr.msk.f32.mxu1 %vm144_vm2, %v4782_v13 }
 0x100   :  { %4141 = vmatmul.mubr.msk.f32.vlgmr.msra.gmra.mrb[0].mxu1 %vm144_vm2, %v4784_v14 }
 0x1d3   :  { %v4142_v16 = vpop.f32.mrb[0].mxu1 }
 0x1d4   :  { %v217_v17 = vpop.f32.mrb[1].mxu1  ;;  %v223_v19 = vadd.f32 %v4142_v16, %v3917_v15 }
 0x1d5   :  { %v218_v18 = vadd.f32 %v3917_v15, %v217_v17 }
 0x1d7   :  { %226 = vxpose.xlu0.b32.start [1/2] (short) (narrow) %v218_v18, 96 }
 0x1db   :  { %227 = vxpose.xlu0.b32.end [2/2] (short) (narrow) %v223_v19, 96 }
 0x257   :  { %v242_v20 = vpop.trf.xlu0 }
 0x258   :  { %258 = vxpose.xlu0.b32.start.end [1/1] (short) (narrow) %v242_v20, 16 }
 0x25b   :  { %v243_v21 = vpop.trf.xlu0 }
 0x25f   :  { %v244_v22 = vpop.trf.xlu0 }
 0x263   :  { %v245_v23 = vpop.trf.xlu0 }
 0x267   :  { %v246_v24 = vpop.trf.xlu0 }
 0x26b   :  { %v247_v25 = vpop.trf.xlu0 }
 0x26c   :  { %v4525_v26 = vpack.i.bf16 %v247_v25, %v246_v24 }
 0x26e   :  { %4526 = vxpose.xlu1.b32.start.end [1/1] (short) (narrow) %v4525_v26, 16 }
 0x26f   :  { %v248_v27 = vpop.trf.xlu0 }
 0x273   :  { %290 = vxpose.xlu1.b32.start.end [1/1] (short) (narrow) %v243_v21, 16  ;;  %v249_v28 = vpop.trf.xlu0 }
 0x277   :  { %v4790_v29 = vpop.trf.xlu0 }
 0x278   :  { %450 = vxpose.xlu1.b32.start.end [1/1] (short) (narrow) %v248_v27, 16 }
 0x27b   :  { %v4792_v30 = vpop.trf.xlu0 }
 0x27d   :  { %482 = vxpose.xlu1.b32.start.end [1/1] (short) (narrow) %v249_v28, 16 }
 0x27f   :  { %v4794_v31 = vpop.trf.xlu0 }
 0x282   :  { %322 = vxpose.xlu1.b32.start.end [1/1] (short) (narrow) %v244_v22, 16 }
 0x283   :  { %v4796_v32 = vpop.trf.xlu0 }
 0x287   :  { %354 = vxpose.xlu1.b32.start.end [1/1] (short) (narrow) %v245_v23, 16 }
 0x2d8   :  { %v274_v33 = vpop.trf.xlu0 }
 0x2d9   :  { %4147 = vmatprep.mubr.msk.f32.mxu0 %vm642_vm3, %v274_v33 }
 0x2dc   :  { %v275_v45 = vpop.trf.xlu0 }
 0x2ee   :  { %v4527_v34 = vpop.trf.xlu1 }
 0x2ef   :  { %v4531_v35 = vunpack.i.h.bf16 %v4527_v34  ;;  %v4528_v36 = vunpack.i.l.bf16 %v4527_v34 }
 0x2f2   :  { %v4532_v37 = vpop.trf.xlu1 }
 0x2f3   :  { %v4536_v38 = vunpack.i.h.bf16 %v4532_v37  ;;  %v4533_v39 = vunpack.i.l.bf16 %v4532_v37 }
 0x2f5   :  { %v4363_v41 = vpack.c.bf16 %v4533_v39, %v4528_v36  ;;  %v4369_v42 = vpack.c.bf16 %v4536_v38, %v4531_v35 }
 0x2f6   :  { %v306_v43 = vpop.trf.xlu1 }
 0x2f7   :  { %4365 = vmatprep.subr.msk.bf16.mxu0 %vm4801_vm4, %v4363_v41  ;;  %4371 = vmatprep.subr.msk.bf16.mxu1 %vm4801_vm4, %v4369_v42 }
 0x2f8   :  { %4154 = vmatprep.mubr.msk.f32.mxu1 %vm642_vm3, %v306_v43  ;;  %4368 = vmatpush3.bf16.xpose.msk.msra.mxu0 %vm4801_vm4, %v4363_v41 }
 0x2f9   :  { %4374 = vmatpush3.bf16.xpose.msk.msra.mxu1 %vm4801_vm4, %v4369_v42 }
 0x2fa   :  { %v307_v44 = vpop.trf.xlu1 }
 0x2fe   :  { %v466_v46 = vpop.trf.xlu1 }
 0x2ff   :  { %4148 = vmatmul.mubr.msk.f32.vlgmr.msra.gmra.mrb[2].mxu0 %vm642_vm3, %v275_v45 }
 0x300   :  { %4155 = vmatmul.mubr.msk.f32.vlgmr.msra.gmra.mrb[2].mxu1 %vm642_vm3, %v307_v44 }
 0x302   :  { %v467_v47 = vpop.trf.xlu1 }
 0x303   :  { %v4375_v48 = vpack.c.bf16 %v467_v47, %v466_v46 }
 0x305   :  { %4377 = vmatprep.subr.msk.bf16.mxu0 %vm4801_vm4, %v4375_v48 }
 0x306   :  { %v498_v49 = vpop.trf.xlu1  ;;  %4380 = vmatpush3.bf16.xpose.msk.msra.mxu0 %vm4801_vm4, %v4375_v48 }
 0x30a   :  { %v499_v50 = vpop.trf.xlu1 }
 0x30b   :  { %v4381_v51 = vpack.c.bf16 %v499_v50, %v498_v49 }
 0x30d   :  { %4383 = vmatprep.subr.msk.bf16.mxu1 %vm4801_vm4, %v4381_v51 }
 0x30e   :  { %4386 = vmatpush3.bf16.xpose.msk.msra.mxu1 %vm4801_vm4, %v4381_v51  ;;  %v338_v52 = vpop.trf.xlu1 }
 0x30f   :  { %4161 = vmatprep.mubr.msk.f32.mxu0 %vm642_vm3, %v338_v52 }
 0x312   :  { %v339_v53 = vpop.trf.xlu1 }
 0x313   :  { %4162 = vmatmul.mubr.msk.f32.vlgmr.msra.gmra.mrb[4].mxu0 %vm642_vm3, %v339_v53 }
 0x316   :  { %v370_v54 = vpop.trf.xlu1 }
 0x317   :  { %4168 = vmatprep.mubr.msk.f32.mxu1 %vm642_vm3, %v370_v54 }
 0x31a   :  { %v371_v55 = vpop.trf.xlu1 }
 0x31b   :  { %4169 = vmatmul.mubr.msk.f32.vlgmr.msra.gmra.mrb[4].mxu1 %vm642_vm3, %v371_v55 }
 0x3d2   :  { %v4149_v56 = vpop.f32.mrb[2].mxu0 }
 0x3d3   :  { %v992_v58 = vmul.f32 0.35355338, %v4149_v56  ;;  %v4156_v59 = vpop.f32.mrb[2].mxu1  ;;  %v721_v60 = vpop.f32.mrb[3].mxu0 }
 0x3d4   :  { %v994_v62 = vmul.f32 0.35355338, %v4156_v59  ;;  %v991_v63 = vmul.f32 0.35355338, %v721_v60  ;;  %v808_v0 = vpop.f32.mrb[3].mxu1 }
 0x3d5   :  { %v1000_v1 = vadd.f32 %v992_v58, %v4828_v57  ;;  %v993_v4 = vmul.f32 0.35355338, %v808_v0 }
 0x3d6   :  { %v999_v2 = vadd.f32 %v991_v63, %v4830_v61  ;;  %v1002_v6 = vadd.f32 %v994_v62, %v4828_v57 }
 0x3d7   :  { %v1011_v3 = vsel %vm1007_vm5, %v1000_v1, -inf  ;;  %v1001_v8 = vadd.f32 %v993_v4, %v4830_v61 }
 0x3d8   :  { %1012 = vmax.xlane.f32.xlu0 %v1011_v3  ;;  %v1008_v5 = vsel %vm1007_vm5, %v999_v2, -inf  ;;  %v1017_v7 = vsel %vm1007_vm5, %v1002_v6, -inf }
 0x3d9   :  { %1009 = vmax.xlane.f32.xlu1 %v1008_v5  ;;  %v1014_v9 = vsel %vm1007_vm5, %v1001_v8, -inf }
 0x3dd   :  { %1018 = vmax.xlane.f32.xlu1 %v1017_v7 }
 0x3e1   :  { %1015 = vmax.xlane.f32.xlu1 %v1014_v9 }
 0x3e6   :  { %v4163_v10 = vpop.f32.mrb[4].mxu0 }
 0x3e7   :  { %v996_v11 = vmul.f32 0.35355338, %v4163_v10  ;;  %v895_v12 = vpop.f32.mrb[5].mxu0 }
 0x3e8   :  { %v995_v15 = vmul.f32 0.35355338, %v895_v12 }
 0x3e9   :  { %v1004_v16 = vadd.f32 %v996_v11, %v4828_v57 }
 0x3ea   :  { %v1003_v18 = vadd.f32 %v995_v15, %v4830_v61 }
 0x3eb   :  { %v1023_v17 = vsel %vm1007_vm5, %v1004_v16, -inf }
 0x3ec   :  { %1024 = vmax.xlane.f32.xlu1 %v1023_v17  ;;  %v1020_v22 = vsel %vm1007_vm5, %v1003_v18, -inf }
 0x3ee   :  { %v4170_v19 = vpop.f32.mrb[4].mxu1 }
 0x3ef   :  { %v998_v20 = vmul.f32 0.35355338, %v4170_v19  ;;  %v982_v21 = vpop.f32.mrb[5].mxu1 }
 0x3f0   :  { %v997_v23 = vmul.f32 0.35355338, %v982_v21  ;;  %1021 = vmax.xlane.f32.xlu1 %v1020_v22 }
 0x3f1   :  { %v1006_v24 = vadd.f32 %v998_v20, %v4828_v57 }
 0x3f2   :  { %v1005_v26 = vadd.f32 %v997_v23, %v4830_v61 }
 0x3f3   :  { %v1029_v25 = vsel %vm1007_vm5, %v1006_v24, -inf }
 0x3f4   :  { %1030 = vmax.xlane.f32.xlu1 %v1029_v25  ;;  %v1026_v27 = vsel %vm1007_vm5, %v1005_v26, -inf }
 0x3f8   :  { %1027 = vmax.xlane.f32.xlu1 %v1026_v27 }
 0x405   :  { %546 = vxpose.xlu0.b32.start.end [1/1] (short) (narrow) %v4792_v30, 16 }
 0x42b   :  { %514 = vxpose.xlu1.b32.start.end [1/1] (short) (narrow) %v4790_v29, 16 }
 0x465   :  { %v1013_v28 = vpop.xlane.xlu0 %1012 }
 0x466   :  { %v1033_v33 = vsub.f32 %v1000_v1, %v1013_v28  ;;  %v1010_v34 = vpop.xlane.xlu1 %1009 }
 0x467   :  { %v1032_v35 = vsub.f32 %v999_v2, %v1010_v34 }
 0x468   :  { %v1042_v36 = vmul.f32 1.442695, %v1033_v33 }
 0x469   :  { %v1040_v37 = vmul.f32 1.442695, %v1032_v35 }
 0x46a   :  { %4585 = vpow2.f32 %v1042_v36  ;;  %v1019_v38 = vpop.xlane.xlu1 %1018 }
 0x46b   :  { %4587 = vpow2.f32 %v1040_v37  ;;  %v1035_v39 = vsub.f32 %v1002_v6, %v1019_v38 }
 0x46d   :  { %v1046_v41 = vmul.f32 1.442695, %v1035_v39 }
 0x46e   :  { %v1016_v42 = vpop.xlane.xlu1 %1015 }
 0x46f   :  { %4589 = vpow2.f32 %v1046_v41  ;;  %v1034_v43 = vsub.f32 %v1001_v8, %v1016_v42 }
 0x471   :  { %v1044_v44 = vmul.f32 1.442695, %v1034_v43 }
 0x473   :  { %4591 = vpow2.f32 %v1044_v44 }
 0x474   :  { %v4586_v45 = vpop.eup %4585 }
 0x475   :  { %v4588_v30 = vpop.eup %4587  ;;  %v1059_v29 = vsel %vm1007_vm5, %v4586_v45, 0.0 }
 0x476   :  { %1060 = vadd.xlane.f32.xlu0 %v1059_v29  ;;  %v1056_v46 = vsel %vm1007_vm5, %v4588_v30, 0.0 }
 0x477   :  { %1057 = vadd.xlane.f32.xlu1 %v1056_v46 }
 0x479   :  { %v4852_v47 = vpop.eup %4589  ;;  %v1025_v48 = vpop.xlane.xlu1 %1024 }
 0x47a   :  { %v1037_v49 = vsub.f32 %v1004_v16, %v1025_v48  ;;  %v1065_v50 = vsel %vm1007_vm5, %v4852_v47, 0.0 }
 0x47b   :  { %1066 = vadd.xlane.f32.xlu0 %v1065_v50 }
 0x47c   :  { %v1050_v51 = vmul.f32 1.442695, %v1037_v49 }
 0x47d   :  { %v4592_v52 = vpop.eup %4591  ;;  %v1022_v53 = vpop.xlane.xlu1 %1021 }
 0x47e   :  { %4593 = vpow2.f32 %v1050_v51  ;;  %v1036_v54 = vsub.f32 %v1003_v18, %v1022_v53  ;;  %v1062_v55 = vsel %vm1007_vm5, %v4592_v52, 0.0 }
 0x47f   :  { %1063 = vadd.xlane.f32.xlu1 %v1062_v55 }
 0x480   :  { %v1048_v56 = vmul.f32 1.442695, %v1036_v54 }
 0x481   :  { %v1031_v58 = vpop.xlane.xlu1 %1030 }
 0x482   :  { %4595 = vpow2.f32 %v1048_v56  ;;  %v1039_v59 = vsub.f32 %v1006_v24, %v1031_v58  ;;  %v1580_v56 = vld [vmem:[#allocation2 + $0x28] sm:$0xff]  ;;  %v1581_v58 = vld [vmem:[#allocation2 + $0x30] sm:$0xff] }
 0x484   :  { %v1054_v60 = vmul.f32 1.442695, %v1039_v59  ;;  %v4403_v59 = vpack.c.bf16 %v1581_v58, %v1580_v56  ;;  %v1827_v58 = vld [vmem:[#allocation2 + $0x98] sm:$0xff] }
 0x485   :  { %v1028_v62 = vpop.xlane.xlu1 %1027  ;;  %v562_v9 = vpop.trf.xlu0 }
 0x486   :  { %4597 = vpow2.f32 %v1054_v60  ;;  %v1038_v63 = vsub.f32 %v1005_v26, %v1028_v62  ;;  %4404 = vmatprep.subr.bf16.mxu1 %v4403_v59 }
 0x487   :  { %4406 = vmatpush3.bf16.msra.mxu1 %v4403_v59  ;;  %v1828_v59 = vld [vmem:[#allocation2 + $0xa0] sm:$0xff] }
 0x488   :  { %v4857_v0 = vpop.eup %4593  ;;  %v1052_v1 = vmul.f32 1.442695, %v1038_v63  ;;  %v1582_v63 = vld [vmem:[#allocation2 + $0x38] sm:$0xff] }
 0x489   :  { %v1071_v2 = vsel %vm1007_vm5, %v4857_v0, 0.0  ;;  %v563_v11 = vpop.trf.xlu0 }
 0x48a   :  { %4599 = vpow2.f32 %v1052_v1  ;;  %1072 = vadd.xlane.f32.xlu0 %v1071_v2  ;;  %v4391_v15 = vpack.c.bf16 %v563_v11, %v562_v9 }
 0x48c   :  { %v4596_v3 = vpop.eup %4595 }
 0x48d   :  { %v1068_v4 = vsel %vm1007_vm5, %v4596_v3, 0.0 }
 0x48e   :  { %1069 = vadd.xlane.f32.xlu1 %v1068_v4 }
 0x490   :  { %v4862_v5 = vpop.eup %4597 }
 0x491   :  { %v1077_v6 = vsel %vm1007_vm5, %v4862_v5, 0.0 }
 0x492   :  { %1078 = vadd.xlane.f32.xlu0 %v1077_v6  ;;  %v3944_v6 = vld [vmem:[#allocation4 + $0x21] ss:$0 sm:$0xff] }
 0x494   :  { %v4600_v7 = vpop.eup %4599 }
 0x495   :  { %v1074_v8 = vsel %vm1007_vm5, %v4600_v7, 0.0 }
 0x496   :  { %1075 = vadd.xlane.f32.xlu1 %v1074_v8 }
 0x4ab   :  { %v530_v10 = vpop.trf.xlu1 }
 0x4af   :  { %v531_v12 = vpop.trf.xlu1 }
 0x4b0   :  { %v4387_v16 = vpack.c.bf16 %v531_v12, %v530_v10 }
 0x4b2   :  { %4388 = vmatprep.subr.bf16.mxu0 %v4387_v16 }
 0x4b3   :  { %4390 = vmatpush3.bf16.msra.mxu0 %v4387_v16 }
 0x4b4   :  { %4392 = vmatprep.subr.bf16.mxu0 %v4391_v15 }
 0x4bf   :  { %578 = vxpose.xlu0.b32.start.end [1/1] (short) (narrow) %v4794_v31, 16 }
 0x4c9   :  { %610 = vxpose.xlu1.b32.start.end [1/1] (short) (narrow) %v4796_v32, 16 }
 0x503   :  { %v1061_v17 = vpop.xlane.xlu0 %1060 }
 0x504   :  { %4601 = vrcp.f32 %v1061_v17  ;;  %v1058_v18 = vpop.xlane.xlu1 %1057 }
 0x505   :  { %4603 = vrcp.f32 %v1058_v18 }
 0x508   :  { %v1067_v19 = vpop.xlane.xlu0 %1066 }
 0x509   :  { %4605 = vrcp.f32 %v1067_v19 }
 0x50c   :  { %v1064_v20 = vpop.xlane.xlu1 %1063 }
 0x50d   :  { %4607 = vrcp.f32 %v1064_v20 }
 0x50e   :  { %v4602_v21 = vpop.eup %4601 }
 0x50f   :  { %v4604_v22 = vpop.eup %4603  ;;  %v1089_v24 = vmul.f32 %v4602_v21, %v4586_v45 }
 0x510   :  { %v1088_v23 = vmul.f32 %v4604_v22, %v4588_v30 }
 0x512   :  { %4175 = vmatprep.mubr.msk.f32.mxu0 %vm1007_vm5, %v1088_v23 }
 0x513   :  { %4176 = vmatmul.mubr.msk.f32.vlgmr.msra.gmra.mrb[6].mxu0 %vm1007_vm5, %v1089_v24  ;;  %v4606_v31 = vpop.eup %4605 }
 0x514   :  { %4394 = vmatpush3.bf16.msra.mxu0 %v4391_v15  ;;  %v1091_v26 = vmul.f32 %v4606_v31, %v4852_v47 }
 0x517   :  { %v4608_v25 = vpop.eup %4607  ;;  %v1073_v34 = vpop.xlane.xlu0 %1072 }
 0x518   :  { %v1090_v32 = vmul.f32 %v4608_v25, %v4592_v52  ;;  %v1714_v25 = vld [vmem:[#allocation2 + $0x50] sm:$0xff] }
 0x51a   :  { %4182 = vmatprep.mubr.msk.f32.mxu0 %vm1007_vm5, %v1090_v32 }
 0x51b   :  { %4183 = vmatmul.mubr.msk.f32.vlgmr.msra.gmra.mrb[8].mxu0 %vm1007_vm5, %v1091_v26  ;;  %v1070_v27 = vpop.xlane.xlu1 %1069  ;;  %v1715_v26 = vld [vmem:[#allocation2 + $0x58] sm:$0xff] }
 0x51c   :  { %4609 = vrcp.f32 %v1070_v27  ;;  %v1716_v27 = vld [vmem:[#allocation2 + $0x60] sm:$0xff] }
 0x51d   :  { %4611 = vrcp.f32 %v1073_v34 }
 0x51f   :  { %v1079_v36 = vpop.xlane.xlu0 %1078 }
 0x523   :  { %v1076_v35 = vpop.xlane.xlu1 %1075 }
 0x524   :  { %4613 = vrcp.f32 %v1076_v35 }
 0x525   :  { %4615 = vrcp.f32 %v1079_v36 }
 0x526   :  { %v4610_v28 = vpop.eup %4609 }
 0x527   :  { %v1092_v33 = vmul.f32 %v4610_v28, %v4596_v3  ;;  %v4612_v41 = vpop.eup %4611  ;;  %v4415_v28 = vpack.c.bf16 %v1716_v27, %v1715_v26 }
 0x528   :  { %v1093_v43 = vmul.f32 %v4612_v41, %v4857_v0  ;;  %v1583_v0 = vld [vmem:[#allocation2 + $0x40] sm:$0xff]  ;;  %v3947_v41 = vld [vmem:[#allocation4 + $0x22] ss:$0 sm:$0xff] }
 0x529   :  { %4189 = vmatprep.mubr.msk.f32.mxu0 %vm1007_vm5, %v1092_v33  ;;  %v4407_v1 = vpack.c.bf16 %v1583_v0, %v1582_v63 }
 0x52b   :  { %4408 = vmatprep.subr.bf16.mxu1 %v4407_v1 }
 0x52c   :  { %4410 = vmatpush3.bf16.msra.mxu1 %v4407_v1 }
 0x52e   :  { %v4614_v42 = vpop.eup %4613 }
 0x52f   :  { %v1094_v45 = vmul.f32 %v4614_v42, %v4600_v7  ;;  %v4616_v46 = vpop.eup %4615 }
 0x530   :  { %v1095_v47 = vmul.f32 %v4616_v46, %v4862_v5 }
 0x53f   :  { %v594_v37 = vpop.trf.xlu0 }
 0x543   :  { %v595_v38 = vpop.trf.xlu0 }
 0x544   :  { %v4395_v39 = vpack.c.bf16 %v595_v38, %v594_v37 }
 0x546   :  { %4396 = vmatprep.subr.bf16.mxu0 %v4395_v39 }
 0x547   :  { %4398 = vmatpush3.bf16.msra.mxu0 %v4395_v39 }
 0x549   :  { %v626_v44 = vpop.trf.xlu1 }
 0x54a   :  { %4190 = vmatmul.mubr.msk.f32.vlgmr.msra.gmra.mrb[10].mxu0 %vm1007_vm5, %v1093_v43  ;;  %v3948_v43 = vld [vmem:[#allocation4 + $0x23] ss:$0 sm:$0xff] }
 0x54b   :  { %4196 = vmatprep.mubr.msk.f32.mxu0 %vm1007_vm5, %v1094_v45 }
 0x54d   :  { %v627_v30 = vpop.trf.xlu1 }
 0x54e   :  { %v4399_v29 = vpack.c.bf16 %v627_v30, %v626_v44 }
 0x550   :  { %4400 = vmatprep.subr.bf16.mxu0 %v4399_v29 }
 0x551   :  { %4402 = vmatpush3.bf16.msra.mxu0 %v4399_v29 }
 0x554   :  { %4197 = vmatmul.mubr.msk.f32.vlgmr.msra.gmra.mrb[12].mxu0 %vm1007_vm5, %v1095_v47 }
 0x5e6   :  { %v4177_v48 = vpop.f32.mrb[6].mxu0 }
 0x5e7   :  { %v1168_v49 = vpop.f32.mrb[7].mxu0 }
 0x5e8   :  { %1420 = vxpose.xlu0.b32.start [1/2] (short) (narrow) %v1168_v49, 8  ;;  %v1822_v49 = vld [vmem:[#allocation2 + $0x70] sm:$0xff] }
 0x5ec   :  { %1421 = vxpose.xlu0.b32.end [2/2] (short) (narrow) %v4177_v48, 8  ;;  %v1821_v48 = vld [vmem:[#allocation2 + $0x68] sm:$0xff] }
 0x5ee   :  { %v4184_v50 = vpop.f32.mrb[8].mxu0 }
 0x5ef   :  { %v1249_v51 = vpop.f32.mrb[9].mxu0 }
 0x5f0   :  { %1452 = vxpose.xlu1.b32.start [1/2] (short) (narrow) %v1249_v51, 8  ;;  %v1823_v51 = vld [vmem:[#allocation2 + $0x78] sm:$0xff] }
 0x5f4   :  { %1453 = vxpose.xlu1.b32.end [2/2] (short) (narrow) %v4184_v50, 8  ;;  %v4419_v50 = vpack.c.bf16 %v1822_v49, %v1821_v48 }
 0x5f6   :  { %4420 = vmatprep.subr.bf16.mxu1 %v4419_v50 }
 0x61d   :  { %v4191_v52 = vpop.f32.mrb[10].mxu0 }
 0x61e   :  { %v1330_v53 = vpop.f32.mrb[11].mxu0 }
 0x61f   :  { %1484 = vxpose.xlu0.b32.start [1/2] (short) (narrow) %v1330_v53, 8 }
 0x623   :  { %1485 = vxpose.xlu0.b32.end [2/2] (short) (narrow) %v4191_v52, 8  ;;  %v1824_v52 = vld [vmem:[#allocation2 + $0x80] sm:$0xff] }
 0x624   :  { %v4423_v53 = vpack.c.bf16 %v1824_v52, %v1823_v51 }
 0x627   :  { %v4198_v54 = vpop.f32.mrb[12].mxu0 }
 0x628   :  { %v1411_v55 = vpop.f32.mrb[13].mxu0 }
 0x629   :  { %1516 = vxpose.xlu1.b32.start [1/2] (short) (narrow) %v1411_v55, 8  ;;  %v1826_v55 = vld [vmem:[#allocation2 + $0x90] sm:$0xff] }
 0x62d   :  { %1517 = vxpose.xlu1.b32.end [2/2] (short) (narrow) %v4198_v54, 8  ;;  %v1825_v54 = vld [vmem:[#allocation2 + $0x88] sm:$0xff] }
 0x62e   :  { %v4427_v56 = vpack.c.bf16 %v1826_v55, %v1825_v54  ;;  %v3955_v54 = vld [vmem:[#allocation4 + $0x26] ss:$0 sm:$0xff] }
 0x668   :  { %v1436_v60 = vpop.trf.xlu0 }
 0x669   :  { %1548 = vxpose.xlu0.b32.start [1/4] (short) (narrow) %v1436_v60, 16  ;;  %v4431_v60 = vpack.c.bf16 %v1828_v59, %v1827_v58 }
 0x670   :  { %v1468_v62 = vpop.trf.xlu1 }
 0x671   :  { %1549 = vxpose.xlu0.b32.cont [2/4] (short) (narrow) %v1468_v62, 16  ;;  %v3949_v62 = vld [vmem:[#allocation4 + $0x24] ss:$0 sm:$0xff] }
 0x69f   :  { %v1500_v2 = vpop.trf.xlu0 }
 0x6a0   :  { %1550 = vxpose.xlu0.b32.cont [3/4] (short) (narrow) %v1500_v2, 16 }
 0x6a9   :  { %v1532_v3 = vpop.trf.xlu1 }
 0x6aa   :  { %1551 = vxpose.xlu0.b32.end [4/4] (short) (narrow) %v1532_v3, 16 }
 0x71e   :  { %v1564_v4 = vpop.trf.xlu0 }
 0x71f   :  { %4207 = vmatprep.mubr.msk.f32.mxu1 %vm144_vm2, %v1564_v4 }
 0x722   :  { %v1565_v5 = vpop.trf.xlu0 }
 0x723   :  { %4208 = vmatmul.mubr.msk.f32.vlgmr.msra.gmra.mrb[6].mxu1 %vm144_vm2, %v1565_v5 }
 0x724   :  { %4422 = vmatpush3.bf16.msra.mxu1 %v4419_v50 }
 0x725   :  { %4424 = vmatprep.subr.bf16.mxu1 %v4423_v53 }
 0x728   :  { %4426 = vmatpush3.bf16.msra.mxu1 %v4423_v53 }
 0x729   :  { %4428 = vmatprep.subr.bf16.mxu1 %v4427_v56 }
 0x72c   :  { %4430 = vmatpush3.bf16.msra.mxu1 %v4427_v56  ;;  %v3956_v56 = vld [vmem:[#allocation4 + $0x27] ss:$0 sm:$0xff] }
 0x72d   :  { %4432 = vmatprep.subr.bf16.mxu1 %v4431_v60 }
 0x730   :  { %4434 = vmatpush3.bf16.msra.mxu1 %v4431_v60 }
 0x7f6   :  { %v4209_v7 = vpop.f32.mrb[6].mxu1 }
 0x7f7   :  { %v1667_v8 = vadd.f32 %v4209_v7, %v3944_v6  ;;  %v1661_v9 = vpop.f32.mrb[7].mxu1 }
 0x7f8   :  { %v1662_v10 = vadd.f32 %v3944_v6, %v1661_v9 }
 0x7f9   :  { %v1671_v11 = vadd.f32 %v1667_v8, %v4784_v14 }
 0x7fa   :  { %v1670_v12 = vadd.f32 %v1662_v10, %v4782_v13  ;;  %v1713_v13 = vld [vmem:[#allocation2 + $0x48] sm:$0xff] }
 0x7fb   :  { %v1677_v15 = vsel %vm144_vm2, %v1671_v11, 0.0  ;;  %v4411_v32 = vpack.c.bf16 %v1714_v25, %v1713_v13 }
 0x7fc   :  { %1678 = vadd.xlane.f32.xlu0 %v1677_v15  ;;  %v1674_v16 = vsel %vm144_vm2, %v1670_v12, 0.0 }
 0x7fd   :  { %1675 = vadd.xlane.f32.xlu1 %v1674_v16  ;;  %4412 = vmatprep.subr.bf16.mxu0 %v4411_v32 }
 0x7fe   :  { %4414 = vmatpush3.bf16.msra.mxu0 %v4411_v32 }
 0x7ff   :  { %4416 = vmatprep.subr.bf16.mxu0 %v4415_v28 }
 0x802   :  { %4418 = vmatpush3.bf16.msra.mxu0 %v4415_v28 }
 0x889   :  { %v1679_v17 = vpop.xlane.xlu0 %1678 }
 0x88a   :  { %v1682_v18 = vmul.f32 0.03125, %v1679_v17  ;;  %v1676_v19 = vpop.xlane.xlu1 %1675 }
 0x88b   :  { %v1681_v20 = vmul.f32 0.03125, %v1676_v19 }
 0x88c   :  { %v1684_v21 = vsub.f32 %v1671_v11, %v1682_v18 }
 0x88d   :  { %v1683_v22 = vsub.f32 %v1670_v12, %v1681_v20 }
 0x88e   :  { %v1686_v31 = vmul.f32 %v1684_v21, %v1684_v21 }
 0x88f   :  { %v1685_v23 = vmul.f32 %v1683_v22, %v1683_v22 }
 0x890   :  { %v1690_v14 = vsel %vm144_vm2, %v1686_v31, 0.0 }
 0x891   :  { %v1687_v24 = vsel %vm144_vm2, %v1685_v23, 0.0  ;;  %v3952_v23 = vld [vmem:[#allocation4 + $0x25] ss:$0 sm:$0xff] }
 0x892   :  { %1688 = vadd.xlane.f32.xlu1 %v1687_v24 }
 0x896   :  { %1691 = vadd.xlane.f32.xlu1 %v1690_v14 }
 0x91f   :  { %v1689_v33 = vpop.xlane.xlu1 %1688 }
 0x920   :  { %v1693_v34 = vmul.f32 0.03125, %v1689_v33 }
 0x922   :  { %v1695_v35 = vadd.f32 1e-05, %v1693_v34 }
 0x923   :  { %v1692_v36 = vpop.xlane.xlu1 %1691 }
 0x924   :  { %4617 = vrsqrt.f32 %v1695_v35  ;;  %v1694_v37 = vmul.f32 0.03125, %v1692_v36 }
 0x926   :  { %v1696_v38 = vadd.f32 1e-05, %v1694_v37 }
 0x928   :  { %4619 = vrsqrt.f32 %v1696_v38 }
 0x92e   :  { %v4618_v39 = vpop.eup %4617 }
 0x92f   :  { %v1699_v42 = vmul.f32 %v4618_v39, %v1683_v22 }
 0x931   :  { %v1705_v44 = vmul.f32 %v3947_v41, %v1699_v42 }
 0x932   :  { %v4620_v45 = vpop.eup %4619 }
 0x933   :  { %v1700_v30 = vmul.f32 %v4620_v45, %v1684_v21  ;;  %v1711_v29 = vadd.f32 %v3948_v43, %v1705_v44  ;;  %v1959_v44 = vld [vmem:[#allocation2 + $0xb0] sm:$0xff] }
 0x935   :  { %v1706_v46 = vmul.f32 %v3947_v41, %v1700_v30  ;;  %4218 = vmatprep.mubr.msk.f32.mxu0 %vm144_vm2, %v1711_v29  ;;  %v1960_v30 = vld [vmem:[#allocation2 + $0xb8] sm:$0xff] }
 0x937   :  { %v1712_v47 = vadd.f32 %v3948_v43, %v1706_v46  ;;  %v1958_v43 = vld [vmem:[#allocation2 + $0xa8] sm:$0xff] }
 0x938   :  { %v4435_v45 = vpack.c.bf16 %v1959_v44, %v1958_v43 }
 0x939   :  { %4219 = vmatmul.mubr.msk.f32.vlgmr.msra.gmra.mrb[14].mxu0 %vm144_vm2, %v1712_v47 }
 0x93a   :  { %4436 = vmatprep.subr.bf16.mxu0 %v4435_v45 }
 0x93b   :  { %4438 = vmatpush3.bf16.msra.mxu0 %v4435_v45 }
 0xa0c   :  { %v4220_v63 = vpop.f32.mrb[14].mxu0 }
 0xa0d   :  { %v1800_v0 = vadd.f32 %v4220_v63, %v3949_v62  ;;  %v1794_v1 = vpop.f32.mrb[15].mxu0 }
 0xa0e   :  { %v1795_v2 = vadd.f32 %v3949_v62, %v1794_v1  ;;  %v3957_v1 = vld [vmem:[#allocation4 + $0x28] ss:$0 sm:$0xff] }
 0xa0f   :  { %v1804_v3 = vmul.f32 %v1800_v0, %v1800_v0 }
 0xa10   :  { %v1803_v4 = vmul.f32 %v1795_v2, %v1795_v2 }
 0xa11   :  { %v1806_v5 = vmul.f32 %v1804_v3, %v1800_v0 }
 0xa12   :  { %v1805_v6 = vmul.f32 %v1803_v4, %v1795_v2 }
 0xa13   :  { %v1808_v7 = vmul.f32 0.044715, %v1806_v5 }
 0xa14   :  { %v1807_v8 = vmul.f32 0.044715, %v1805_v6 }
 0xa15   :  { %v1810_v9 = vadd.f32 %v1808_v7, %v1800_v0 }
 0xa16   :  { %v1809_v10 = vadd.f32 %v1807_v8, %v1795_v2 }
 0xa17   :  { %v1812_v11 = vmul.f32 0.7978846, %v1810_v9 }
 0xa18   :  { %v1811_v12 = vmul.f32 0.7978846, %v1809_v10 }
 0xa19   :  { %4621 = vtanh.f32 %v1812_v11 }
 0xa1a   :  { %4623 = vtanh.f32 %v1811_v12 }
 0xa23   :  { %v4622_v15 = vpop.eup %4621 }
 0xa24   :  { %v4624_v16 = vpop.eup %4623  ;;  %v1816_v17 = vadd.f32 1.0, %v4622_v15 }
 0xa25   :  { %v1815_v18 = vadd.f32 1.0, %v4624_v16 }
 0xa26   :  { %v1818_v19 = vmul.f32 0.5, %v1816_v17 }
 0xa27   :  { %v1817_v20 = vmul.f32 0.5, %v1815_v18 }
 0xa28   :  { %v1820_v22 = vmul.f32 %v1818_v19, %v1800_v0 }
 0xa29   :  { %v1819_v21 = vmul.f32 %v1817_v20, %v1795_v2 }
 0xa2b   :  { %4237 = vmatprep.mubr.msk.f32.mxu1 %vm1834_vm6, %v1819_v21 }
 0xa2c   :  { %4238 = vmatmul.mubr.msk.f32.vlgmr.msra.gmra.mrb[8].mxu1 %vm1834_vm6, %v1820_v22 }
 0xaff   :  { %v4239_v24 = vpop.f32.mrb[8].mxu1 }
 0xb00   :  { %v1907_v31 = vpop.f32.mrb[9].mxu1  ;;  %v1913_v14 = vadd.f32 %v4239_v24, %v3952_v23 }
 0xb01   :  { %v1908_v13 = vadd.f32 %v3952_v23, %v1907_v31 }
 0xb02   :  { %v1917_v26 = vadd.f32 %v1913_v14, %v1712_v47 }
 0xb03   :  { %v1916_v25 = vadd.f32 %v1908_v13, %v1711_v29  ;;  %v1961_v29 = vld [vmem:[#allocation2 + $0xc0] sm:$0xff] }
 0xb04   :  { %v1923_v27 = vsel %vm144_vm2, %v1917_v26, 0.0  ;;  %v4439_v46 = vpack.c.bf16 %v1961_v29, %v1960_v30 }
 0xb05   :  { %v1920_v32 = vsel %vm144_vm2, %v1916_v25, 0.0 }
 0xb06   :  { %1921 = vadd.xlane.f32.xlu1 %v1920_v32  ;;  %4440 = vmatprep.subr.bf16.mxu0 %v4439_v46 }
 0xb07   :  { %4442 = vmatpush3.bf16.msra.mxu0 %v4439_v46 }
 0xb0a   :  { %1924 = vadd.xlane.f32.xlu1 %v1923_v27 }
 0xb93   :  { %v1922_v28 = vpop.xlane.xlu1 %1921 }
 0xb94   :  { %v1926_v33 = vmul.f32 0.03125, %v1922_v28 }
 0xb96   :  { %v1928_v34 = vsub.f32 %v1916_v25, %v1926_v33 }
 0xb97   :  { %v1925_v35 = vpop.xlane.xlu1 %1924 }
 0xb98   :  { %v1927_v36 = vmul.f32 0.03125, %v1925_v35  ;;  %v1930_v37 = vmul.f32 %v1928_v34, %v1928_v34 }
 0xb9a   :  { %v1929_v38 = vsub.f32 %v1917_v26, %v1927_v36  ;;  %v1932_v39 = vsel %vm144_vm2, %v1930_v37, 0.0 }
 0xb9b   :  { %1933 = vadd.xlane.f32.xlu1 %v1932_v39 }
 0xb9c   :  { %v1931_v41 = vmul.f32 %v1929_v38, %v1929_v38 }
 0xb9e   :  { %v1935_v42 = vsel %vm144_vm2, %v1931_v41, 0.0 }
 0xb9f   :  { %1936 = vadd.xlane.f32.xlu0 %v1935_v42 }
 0xc28   :  { %v1934_v47 = vpop.xlane.xlu1 %1933 }
 0xc29   :  { %v1938_v48 = vmul.f32 0.03125, %v1934_v47 }
 0xc2b   :  { %v1940_v49 = vadd.f32 1e-05, %v1938_v48 }
 0xc2c   :  { %v1937_v50 = vpop.xlane.xlu0 %1936 }
 0xc2d   :  { %4625 = vrsqrt.f32 %v1940_v49  ;;  %v1939_v51 = vmul.f32 0.03125, %v1937_v50 }
 0xc2f   :  { %v1941_v52 = vadd.f32 1e-05, %v1939_v51 }
 0xc31   :  { %4627 = vrsqrt.f32 %v1941_v52 }
 0xc37   :  { %v4626_v53 = vpop.eup %4625 }
 0xc38   :  { %v1944_v55 = vmul.f32 %v4626_v53, %v1928_v34 }
 0xc3a   :  { %v1950_v58 = vmul.f32 %v3955_v54, %v1944_v55 }
 0xc3b   :  { %v4628_v59 = vpop.eup %4627 }
 0xc3c   :  { %v1945_v60 = vmul.f32 %v4628_v59, %v1929_v38  ;;  %v4896_v62 = vadd.f32 %v3956_v56, %v1950_v58 }
 0xc3e   :  { %v1951_v63 = vmul.f32 %v3955_v54, %v1945_v60  ;;  %4248 = vmatprep.mubr.msk.f32.mxu0 %vm144_vm2, %v4896_v62 }
 0xc40   :  { %v4900_v0 = vadd.f32 %v3956_v56, %v1951_v63 }
 0xc42   :  { %4249 = vmatmul.mubr.msk.f32.vlgmr.msra.gmra.mrb[16].mxu0 %vm144_vm2, %v4900_v0 }
 0xd15   :  { %v4250_v2 = vpop.f32.mrb[16].mxu0 }
 0xd16   :  { %v2039_v3 = vpop.f32.mrb[17].mxu0  ;;  %v2045_v5 = vadd.f32 %v4250_v2, %v3957_v1 }
 0xd17   :  { %v2040_v4 = vadd.f32 %v3957_v1, %v2039_v3 }
 0xd19   :  { %2048 = vxpose.xlu1.b32.start [1/2] (short) (narrow) %v2040_v4, 96 }
 0xd1d   :  { %2049 = vxpose.xlu1.b32.end [2/2] (short) (narrow) %v2045_v5, 96 }
 0xd99   :  { %v2064_v6 = vpop.trf.xlu1 }
 0xd9d   :  { %v2065_v7 = vpop.trf.xlu1 }
 0xd9e   :  { %2112 = vxpose.xlu1.b32.start.end [1/1] (short) (narrow) %v2065_v7, 16 }
 0xda1   :  { %v2066_v8 = vpop.trf.xlu1 }
 0xda5   :  { %v2067_v9 = vpop.trf.xlu1 }
 0xda9   :  { %v2068_v10 = vpop.trf.xlu1 }
 0xdad   :  { %v2069_v11 = vpop.trf.xlu1 }
 0xdae   :  { %v4537_v12 = vpack.i.bf16 %v2069_v11, %v2068_v10 }
 0xdb0   :  { %4538 = vxpose.xlu0.b32.start.end [1/1] (short) (narrow) %v4537_v12, 16 }
 0xdb1   :  { %v2070_v15 = vpop.trf.xlu1 }
 0xdb5   :  { %v2071_v16 = vpop.trf.xlu1 }
 0xdb6   :  { %v4549_v17 = vpack.i.bf16 %v2071_v16, %v2070_v15 }
 0xdb8   :  { %4550 = vxpose.xlu0.b32.start.end [1/1] (short) (narrow) %v4549_v17, 16 }
 0xdb9   :  { %v4904_v18 = vpop.trf.xlu1 }
 0xdbd   :  { %2080 = vxpose.xlu0.b32.start.end [1/1] (short) (narrow) %v2064_v6, 16  ;;  %v4906_v19 = vpop.trf.xlu1 }
 0xdbe   :  { %v4561_v20 = vpack.i.bf16 %v4906_v19, %v4904_v18 }
 0xdc1   :  { %v4910_v21 = vpop.trf.xlu1 }
 0xdc2   :  { %2144 = vxpose.xlu0.b32.start.end [1/1] (short) (narrow) %v2066_v8, 16 }
 0xdc5   :  { %v4912_v22 = vpop.trf.xlu1 }
 0xdc7   :  { %2176 = vxpose.xlu0.b32.start.end [1/1] (short) (narrow) %v2067_v9, 16 }
 0xe1e   :  { %v2128_v23 = vpop.trf.xlu1 }
 0xe1f   :  { %4262 = vmatprep.mubr.msk.f32.mxu1 %vm642_vm3, %v2128_v23 }
 0xe22   :  { %v2129_v41 = vpop.trf.xlu1 }
 0xe30   :  { %v4539_v24 = vpop.trf.xlu0 }
 0xe31   :  { %v4543_v31 = vunpack.i.h.bf16 %v4539_v24  ;;  %v4540_v14 = vunpack.i.l.bf16 %v4539_v24 }
 0xe34   :  { %v4544_v13 = vpop.trf.xlu0 }
 0xe35   :  { %v4548_v25 = vunpack.i.h.bf16 %v4544_v13  ;;  %v4545_v32 = vunpack.i.l.bf16 %v4544_v13 }
 0xe37   :  { %v4443_v26 = vpack.c.bf16 %v4545_v32, %v4540_v14  ;;  %v4449_v27 = vpack.c.bf16 %v4548_v25, %v4543_v31 }
 0xe38   :  { %v4551_v28 = vpop.trf.xlu0 }
 0xe39   :  { %4445 = vmatprep.subr.msk.bf16.mxu0 %vm4801_vm4, %v4443_v26  ;;  %4451 = vmatprep.subr.msk.bf16.mxu1 %vm4801_vm4, %v4449_v27  ;;  %v4555_v33 = vunpack.i.h.bf16 %v4551_v28  ;;  %v4552_v34 = vunpack.i.l.bf16 %v4551_v28 }
 0xe3a   :  { %4448 = vmatpush3.bf16.xpose.msk.msra.mxu0 %vm4801_vm4, %v4443_v26  ;;  %4454 = vmatpush3.bf16.xpose.msk.msra.mxu1 %vm4801_vm4, %v4449_v27 }
 0xe3c   :  { %v4556_v35 = vpop.trf.xlu0 }
 0xe3d   :  { %v4560_v36 = vunpack.i.h.bf16 %v4556_v35  ;;  %v4557_v37 = vunpack.i.l.bf16 %v4556_v35 }
 0xe3f   :  { %v4455_v38 = vpack.c.bf16 %v4557_v37, %v4552_v34  ;;  %v4461_v39 = vpack.c.bf16 %v4560_v36, %v4555_v33 }
 0xe40   :  { %v2096_v42 = vpop.trf.xlu0 }
 0xe41   :  { %4255 = vmatprep.mubr.msk.f32.mxu0 %vm642_vm3, %v2096_v42  ;;  %4457 = vmatprep.subr.msk.bf16.mxu0 %vm4801_vm4, %v4455_v38 }
 0xe42   :  { %4463 = vmatprep.subr.msk.bf16.mxu1 %vm4801_vm4, %v4461_v39  ;;  %4263 = vmatmul.mubr.msk.f32.vlgmr.msra.gmra.mrb[10].mxu1 %vm642_vm3, %v2129_v41 }
 0xe43   :  { %4466 = vmatpush3.bf16.xpose.msk.msra.mxu1 %vm4801_vm4, %v4461_v39 }
 0xe44   :  { %v2097_v43 = vpop.trf.xlu0 }
 0xe45   :  { %4256 = vmatmul.mubr.msk.f32.vlgmr.msra.gmra.mrb[18].mxu0 %vm642_vm3, %v2097_v43 }
 0xe46   :  { %4460 = vmatpush3.bf16.xpose.msk.msra.mxu0 %vm4801_vm4, %v4455_v38 }
 0xe48   :  { %v2160_v44 = vpop.trf.xlu0 }
 0xe49   :  { %4269 = vmatprep.mubr.msk.f32.mxu0 %vm642_vm3, %v2160_v44 }
 0xe4c   :  { %v2161_v45 = vpop.trf.xlu0 }
 0xe4d   :  { %4270 = vmatmul.mubr.msk.f32.vlgmr.msra.gmra.mrb[20].mxu0 %vm642_vm3, %v2161_v45 }
 0xe50   :  { %v2192_v30 = vpop.trf.xlu0 }
 0xe51   :  { %4276 = vmatprep.mubr.msk.f32.mxu1 %vm642_vm3, %v2192_v30 }
 0xe54   :  { %v2193_v29 = vpop.trf.xlu0 }
 0xe55   :  { %4277 = vmatmul.mubr.msk.f32.vlgmr.msra.gmra.mrb[12].mxu1 %vm642_vm3, %v2193_v29 }
 0xf15   :  { %v4264_v46 = vpop.f32.mrb[10].mxu1 }
 0xf16   :  { %v2629_v47 = vpop.f32.mrb[11].mxu1  ;;  %v2815_v49 = vmul.f32 0.35355338, %v4264_v46 }
 0xf17   :  { %v2814_v56 = vmul.f32 0.35355338, %v2629_v47 }
 0xf18   :  { %v4257_v48 = vpop.f32.mrb[18].mxu0  ;;  %v2823_v54 = vadd.f32 %v2815_v49, %v4828_v57 }
 0xf19   :  { %v2813_v50 = vmul.f32 0.35355338, %v4257_v48  ;;  %v2542_v51 = vpop.f32.mrb[19].mxu0  ;;  %v2822_v2 = vadd.f32 %v2814_v56, %v4830_v61 }
 0xf1a   :  { %v2812_v40 = vmul.f32 0.35355338, %v2542_v51  ;;  %v2837_v60 = vsel %vm1007_vm5, %v2823_v54, -inf }
 0xf1b   :  { %v2821_v52 = vadd.f32 %v2813_v50, %v4828_v57  ;;  %v2834_v5 = vsel %vm1007_vm5, %v2822_v2, -inf }
 0xf1c   :  { %v2820_v53 = vadd.f32 %v2812_v40, %v4830_v61 }
 0xf1d   :  { %v2831_v55 = vsel %vm1007_vm5, %v2821_v52, -inf }
 0xf1e   :  { %2832 = vmax.xlane.f32.xlu1 %v2831_v55  ;;  %v2828_v58 = vsel %vm1007_vm5, %v2820_v53, -inf }
 0xf1f   :  { %2829 = vmax.xlane.f32.xlu0 %v2828_v58 }
 0xf20   :  { %v4271_v59 = vpop.f32.mrb[20].mxu0 }
 0xf21   :  { %v2817_v63 = vmul.f32 0.35355338, %v4271_v59  ;;  %v2716_v1 = vpop.f32.mrb[21].mxu0 }
 0xf22   :  { %v2816_v4 = vmul.f32 0.35355338, %v2716_v1 }
 0xf23   :  { %2838 = vmax.xlane.f32.xlu0 %v2837_v60  ;;  %v2825_v3 = vadd.f32 %v2817_v63, %v4828_v57  ;;  %v4573_v63 = vpack.i.bf16 %v4912_v22, %v4910_v21 }
 0xf24   :  { %v2824_v10 = vadd.f32 %v2816_v4, %v4830_v61 }
 0xf25   :  { %v2843_v6 = vsel %vm1007_vm5, %v2825_v3, -inf }
 0xf26   :  { %v2840_v15 = vsel %vm1007_vm5, %v2824_v10, -inf }
 0xf27   :  { %2835 = vmax.xlane.f32.xlu0 %v2834_v5 }
 0xf28   :  { %v4278_v7 = vpop.f32.mrb[12].mxu1 }
 0xf29   :  { %v2803_v8 = vpop.f32.mrb[13].mxu1  ;;  %v2819_v12 = vmul.f32 0.35355338, %v4278_v7 }
 0xf2a   :  { %v2818_v9 = vmul.f32 0.35355338, %v2803_v8 }
 0xf2b   :  { %2844 = vmax.xlane.f32.xlu0 %v2843_v6  ;;  %v2827_v17 = vadd.f32 %v2819_v12, %v4828_v57 }
 0xf2c   :  { %v2826_v11 = vadd.f32 %v2818_v9, %v4830_v61 }
 0xf2d   :  { %v2849_v23 = vsel %vm1007_vm5, %v2827_v17, -inf }
 0xf2e   :  { %v2846_v16 = vsel %vm1007_vm5, %v2826_v11, -inf }
 0xf2f   :  { %2841 = vmax.xlane.f32.xlu0 %v2840_v15 }
 0xf33   :  { %2847 = vmax.xlane.f32.xlu0 %v2846_v16 }
 0xf37   :  { %2850 = vmax.xlane.f32.xlu0 %v2849_v23 }
 0xfab   :  { %v2833_v24 = vpop.xlane.xlu1 %2832 }
 0xfac   :  { %v2853_v31 = vsub.f32 %v2821_v52, %v2833_v24  ;;  %v2830_v14 = vpop.xlane.xlu0 %2829 }
 0xfad   :  { %v2852_v13 = vsub.f32 %v2820_v53, %v2830_v14 }
 0xfae   :  { %v2862_v25 = vmul.f32 1.442695, %v2853_v31 }
 0xfaf   :  { %v2860_v32 = vmul.f32 1.442695, %v2852_v13 }
 0xfb0   :  { %4629 = vpow2.f32 %v2862_v25  ;;  %v2839_v61 = vpop.xlane.xlu0 %2838 }
 0xfb1   :  { %4631 = vpow2.f32 %v2860_v32  ;;  %v2855_v26 = vsub.f32 %v2823_v54, %v2839_v61 }
 0xfb3   :  { %v2866_v27 = vmul.f32 1.442695, %v2855_v26 }
 0xfb4   :  { %v2836_v28 = vpop.xlane.xlu0 %2835 }
 0xfb5   :  { %4633 = vpow2.f32 %v2866_v27  ;;  %v2854_v33 = vsub.f32 %v2822_v2, %v2836_v28 }
 0xfb7   :  { %v2864_v34 = vmul.f32 1.442695, %v2854_v33 }
 0xfb8   :  { %v2845_v57 = vpop.xlane.xlu0 %2844 }
 0xfb9   :  { %4635 = vpow2.f32 %v2864_v34  ;;  %v2857_v35 = vsub.f32 %v2825_v3, %v2845_v57 }
 0xfba   :  { %v4954_v36 = vpop.eup %4629 }
 0xfbb   :  { %v4632_v37 = vpop.eup %4631  ;;  %v2870_v38 = vmul.f32 1.442695, %v2857_v35  ;;  %v2879_v39 = vsel %vm1007_vm5, %v4954_v36, 0.0 }
 0xfbc   :  { %v2842_v41 = vpop.xlane.xlu0 %2841  ;;  %2880 = vadd.xlane.f32.xlu0 %v2879_v39  ;;  %v2876_v42 = vsel %vm1007_vm5, %v4632_v37, 0.0 }
 0xfbd   :  { %4637 = vpow2.f32 %v2870_v38  ;;  %v2856_v43 = vsub.f32 %v2824_v10, %v2842_v41  ;;  %2877 = vadd.xlane.f32.xlu1 %v2876_v42 }
 0xfbf   :  { %v4959_v44 = vpop.eup %4633  ;;  %v2868_v45 = vmul.f32 1.442695, %v2856_v43 }
 0xfc0   :  { %v2848_v30 = vpop.xlane.xlu0 %2847  ;;  %v2885_v29 = vsel %vm1007_vm5, %v4959_v44, 0.0 }
 0xfc1   :  { %4639 = vpow2.f32 %v2868_v45  ;;  %v2858_v46 = vsub.f32 %v2826_v11, %v2848_v30  ;;  %2886 = vadd.xlane.f32.xlu0 %v2885_v29 }
 0xfc3   :  { %v4963_v47 = vpop.eup %4635  ;;  %v2872_v48 = vmul.f32 1.442695, %v2858_v46 }
 0xfc4   :  { %v2851_v49 = vpop.xlane.xlu0 %2850  ;;  %v2882_v50 = vsel %vm1007_vm5, %v4963_v47, 0.0 }
 0xfc5   :  { %4641 = vpow2.f32 %v2872_v48  ;;  %v2859_v51 = vsub.f32 %v2827_v17, %v2851_v49  ;;  %2883 = vadd.xlane.f32.xlu1 %v2882_v50  ;;  %v3400_v48 = vld [vmem:[#allocation2 + $0xc8] sm:$0xff]  ;;  %v3401_v49 = vld [vmem:[#allocation2 + $0xd0] sm:$0xff] }
 0xfc6   :  { %v4483_v50 = vpack.c.bf16 %v3401_v49, %v3400_v48  ;;  %v3989_v49 = vld [vmem:[#allocation4 + $0x2c] ss:$0 sm:$0xff] }
 0xfc7   :  { %v4638_v40 = vpop.eup %4637  ;;  %v2874_v52 = vmul.f32 1.442695, %v2859_v51 }
 0xfc8   :  { %v2891_v53 = vsel %vm1007_vm5, %v4638_v40, 0.0 }
 0xfc9   :  { %4643 = vpow2.f32 %v2874_v52  ;;  %2892 = vadd.xlane.f32.xlu0 %v2891_v53  ;;  %v3403_v52 = vld [vmem:[#allocation2 + $0xe0] sm:$0xff] }
 0xfcb   :  { %v4640_v54 = vpop.eup %4639 }
 0xfcc   :  { %v2888_v55 = vsel %vm1007_vm5, %v4640_v54, 0.0 }
 0xfcd   :  { %2889 = vadd.xlane.f32.xlu1 %v2888_v55 }
 0xfcf   :  { %v4969_v56 = vpop.eup %4641 }
 0xfd0   :  { %v2894_v58 = vsel %vm1007_vm5, %v4969_v56, 0.0 }
 0xfd1   :  { %2895 = vadd.xlane.f32.xlu1 %v2894_v58 }
 0xfd3   :  { %v4973_v59 = vpop.eup %4643 }
 0xfd4   :  { %v2897_v60 = vsel %vm1007_vm5, %v4973_v59, 0.0 }
 0xfd5   :  { %2898 = vadd.xlane.f32.xlu0 %v2897_v60  ;;  %v3984_v60 = vld [vmem:[#allocation4 + $0x29] ss:$0 sm:$0xff] }
0x1002   :  { %4574 = vxpose.xlu0.b32.start.end [1/1] (short) (narrow) %v4573_v63, 16 }
0x1004   :  { %4562 = vxpose.xlu1.b32.start.end [1/1] (short) (narrow) %v4561_v20, 16 }
0x1049   :  { %v2881_v8 = vpop.xlane.xlu0 %2880 }
0x104a   :  { %v2878_v1 = vpop.xlane.xlu1 %2877 }
0x104b   :  { %4645 = vrcp.f32 %v2878_v1 }
0x104e   :  { %v2887_v21 = vpop.xlane.xlu0 %2886 }
0x1052   :  { %v2884_v3 = vpop.xlane.xlu1 %2883 }
0x1055   :  { %v4646_v2 = vpop.eup %4645 }
0x1056   :  { %v2908_v4 = vmul.f32 %v4646_v2, %v4632_v37  ;;  %v2893_v22 = vpop.xlane.xlu0 %2892 }
0x1058   :  { %4283 = vmatprep.mubr.msk.f32.mxu0 %vm1007_vm5, %v2908_v4 }
0x105a   :  { %v2890_v5 = vpop.xlane.xlu1 %2889 }
0x105b   :  { %4647 = vrcp.f32 %v2890_v5 }
0x105c   :  { %4649 = vrcp.f32 %v2893_v22 }
0x105d   :  { %4651 = vrcp.f32 %v2881_v8 }
0x105e   :  { %v2896_v10 = vpop.xlane.xlu1 %2895  ;;  %4653 = vrcp.f32 %v2884_v3 }
0x105f   :  { %4655 = vrcp.f32 %v2887_v21 }
0x1060   :  { %4657 = vrcp.f32 %v2896_v10 }
0x1062   :  { %v2899_v9 = vpop.xlane.xlu0 %2898 }
0x1063   :  { %4659 = vrcp.f32 %v2899_v9 }
0x1065   :  { %v4648_v6 = vpop.eup %4647 }
0x1066   :  { %v2912_v7 = vmul.f32 %v4648_v6, %v4640_v54  ;;  %v4650_v31 = vpop.eup %4649 }
0x1067   :  { %v4652_v25 = vpop.eup %4651  ;;  %v2913_v28 = vmul.f32 %v4650_v31, %v4638_v40  ;;  %v3402_v40 = vld [vmem:[#allocation2 + $0xd8] sm:$0xff] }
0x1068   :  { %4297 = vmatprep.mubr.msk.f32.mxu1 %vm1007_vm5, %v2912_v7  ;;  %v4654_v32 = vpop.eup %4653  ;;  %v2909_v33 = vmul.f32 %v4652_v25, %v4954_v36  ;;  %v4487_v53 = vpack.c.bf16 %v3403_v52, %v3402_v40 }
0x1069   :  { %v4656_v34 = vpop.eup %4655  ;;  %v2910_v57 = vmul.f32 %v4654_v32, %v4963_v47 }
0x106a   :  { %v4658_v35 = vpop.eup %4657  ;;  %v2911_v38 = vmul.f32 %v4656_v34, %v4959_v44 }
0x106b   :  { %v2914_v41 = vmul.f32 %v4658_v35, %v4969_v56 }
0x106d   :  { %v4660_v39 = vpop.eup %4659 }
0x106e   :  { %v2915_v36 = vmul.f32 %v4660_v39, %v4973_v59  ;;  %v3640_v39 = vld [vmem:[#allocation2 + $0x108] sm:$0xff] }
0x1082   :  { %v4575_v18 = vpop.trf.xlu0 }
0x1083   :  { %v4576_v20 = vunpack.i.l.bf16 %v4575_v18  ;;  %v4579_v61 = vunpack.i.h.bf16 %v4575_v18 }
0x1084   :  { %v4563_v19 = vpop.trf.xlu1 }
0x1085   :  { %v4564_v15 = vunpack.i.l.bf16 %v4563_v19  ;;  %v4567_v14 = vunpack.i.h.bf16 %v4563_v19 }
0x1086   :  { %v4580_v11 = vpop.trf.xlu0 }
0x1087   :  { %v4581_v12 = vunpack.i.l.bf16 %v4580_v11  ;;  %v4584_v26 = vunpack.i.h.bf16 %v4580_v11 }
0x1088   :  { %v4568_v16 = vpop.trf.xlu1 }
0x1089   :  { %v4572_v17 = vunpack.i.h.bf16 %v4568_v16  ;;  %v4569_v23 = vunpack.i.l.bf16 %v4568_v16  ;;  %v4475_v24 = vpack.c.bf16 %v4581_v12, %v4576_v20  ;;  %v4479_v37 = vpack.c.bf16 %v4584_v26, %v4579_v61  ;;  %v3533_v12 = vld [vmem:[#allocation2 + $0xf0] sm:$0xff]  ;;  %v3534_v16 = vld [vmem:[#allocation2 + $0xf8] sm:$0xff] }
0x108a   :  { %v3987_v26 = vld [vmem:[#allocation4 + $0x2a] ss:$0 sm:$0xff] }
0x108b   :  { %v4467_v13 = vpack.c.bf16 %v4569_v23, %v4564_v15  ;;  %4476 = vmatprep.subr.bf16.mxu1 %v4475_v24  ;;  %v4471_v27 = vpack.c.bf16 %v4572_v17, %v4567_v14  ;;  %v3535_v17 = vld [vmem:[#allocation2 + $0x100] sm:$0xff] }
0x108c   :  { %4478 = vmatpush3.bf16.msra.mxu1 %v4475_v24  ;;  %v4495_v23 = vpack.c.bf16 %v3535_v17, %v3534_v16 }
0x108d   :  { %4468 = vmatprep.subr.bf16.mxu0 %v4467_v13  ;;  %4484 = vmatprep.subr.bf16.mxu1 %v4483_v50 }
0x108e   :  { %4470 = vmatpush3.bf16.msra.mxu0 %v4467_v13 }
0x108f   :  { %4472 = vmatprep.subr.bf16.mxu0 %v4471_v27  ;;  %4298 = vmatmul.mubr.msk.f32.vlgmr.msra.gmra.mrb[14].mxu1 %vm1007_vm5, %v2913_v28  ;;  %v3988_v28 = vld [vmem:[#allocation4 + $0x2b] ss:$0 sm:$0xff] }
0x1090   :  { %4486 = vmatpush3.bf16.msra.mxu1 %v4483_v50 }
0x1091   :  { %4284 = vmatmul.mubr.msk.f32.vlgmr.msra.gmra.mrb[22].mxu0 %vm1007_vm5, %v2909_v33  ;;  %4488 = vmatprep.subr.bf16.mxu1 %v4487_v53 }
0x1092   :  { %4474 = vmatpush3.bf16.msra.mxu0 %v4471_v27  ;;  %4290 = vmatprep.mubr.msk.f32.mxu0 %vm1007_vm5, %v2910_v57 }
0x1093   :  { %4480 = vmatprep.subr.bf16.mxu0 %v4479_v37 }
0x1094   :  { %4490 = vmatpush3.bf16.msra.mxu1 %v4487_v53 }
0x1095   :  { %4291 = vmatmul.mubr.msk.f32.vlgmr.msra.gmra.mrb[24].mxu0 %vm1007_vm5, %v2911_v38 }
0x1096   :  { %4482 = vmatpush3.bf16.msra.mxu0 %v4479_v37  ;;  %4304 = vmatprep.mubr.msk.f32.mxu0 %vm1007_vm5, %v2914_v41  ;;  %v3641_v41 = vld [vmem:[#allocation2 + $0x110] sm:$0xff] }
0x1099   :  { %4305 = vmatmul.mubr.msk.f32.vlgmr.msra.gmra.mrb[26].mxu0 %vm1007_vm5, %v2915_v36  ;;  %v4499_v36 = vpack.c.bf16 %v3641_v41, %v3640_v39 }
0x109b   :  { %4500 = vmatprep.subr.bf16.mxu1 %v4499_v36 }
0x1162   :  { %v4299_v42 = vpop.f32.mrb[14].mxu1 }
0x1163   :  { %v3150_v43 = vpop.f32.mrb[15].mxu1 }
0x1164   :  { %v4285_v45 = vpop.f32.mrb[22].mxu0 }
0x1165   :  { %v2988_v30 = vpop.f32.mrb[23].mxu0 }
0x1166   :  { %3240 = vxpose.xlu0.b32.start [1/2] (short) (narrow) %v2988_v30, 8  ;;  %v3644_v30 = vld [vmem:[#allocation2 + $0x128] sm:$0xff] }
0x1168   :  { %v4292_v29 = vpop.f32.mrb[24].mxu0 }
0x1169   :  { %v3069_v44 = vpop.f32.mrb[25].mxu0 }
0x116a   :  { %3241 = vxpose.xlu0.b32.end [2/2] (short) (narrow) %v4285_v45, 8  ;;  %3272 = vxpose.xlu1.b32.start [1/2] (short) (narrow) %v3069_v44, 8 }
0x116c   :  { %v4306_v46 = vpop.f32.mrb[26].mxu0 }
0x116d   :  { %v3231_v47 = vpop.f32.mrb[27].mxu0 }
0x116e   :  { %3304 = vxpose.xlu0.b32.start [1/2] (short) (narrow) %v3150_v43, 8  ;;  %3273 = vxpose.xlu1.b32.end [2/2] (short) (narrow) %v4292_v29, 8  ;;  %v3643_v43 = vld [vmem:[#allocation2 + $0x120] sm:$0xff]  ;;  %v3645_v29 = vld [vmem:[#allocation2 + $0x130] sm:$0xff] }
0x116f   :  { %v4507_v44 = vpack.c.bf16 %v3645_v29, %v3644_v30 }
0x1172   :  { %3305 = vxpose.xlu0.b32.end [2/2] (short) (narrow) %v4299_v42, 8  ;;  %3336 = vxpose.xlu1.b32.start [1/2] (short) (narrow) %v3231_v47, 8  ;;  %v3642_v42 = vld [vmem:[#allocation2 + $0x118] sm:$0xff]  ;;  %v3647_v47 = vld [vmem:[#allocation2 + $0x140] sm:$0xff] }
0x1173   :  { %v4503_v45 = vpack.c.bf16 %v3643_v43, %v3642_v42 }
0x1176   :  { %3337 = vxpose.xlu1.b32.end [2/2] (short) (narrow) %v4306_v46, 8  ;;  %v3646_v46 = vld [vmem:[#allocation2 + $0x138] sm:$0xff] }
0x1177   :  { %v4511_v48 = vpack.c.bf16 %v3647_v47, %v3646_v46 }
0x11e6   :  { %v3256_v51 = vpop.trf.xlu0 }
0x11e7   :  { %3368 = vxpose.xlu0.b32.start [1/4] (short) (narrow) %v3256_v51, 16 }
0x11ea   :  { %v3288_v54 = vpop.trf.xlu1 }
0x11eb   :  { %3369 = vxpose.xlu0.b32.cont [2/4] (short) (narrow) %v3288_v54, 16 }
0x11ee   :  { %v3320_v55 = vpop.trf.xlu0 }
0x11ef   :  { %3370 = vxpose.xlu0.b32.cont [3/4] (short) (narrow) %v3320_v55, 16 }
0x11f2   :  { %v3352_v56 = vpop.trf.xlu1 }
0x11f3   :  { %3371 = vxpose.xlu0.b32.end [4/4] (short) (narrow) %v3352_v56, 16 }
0x1267   :  { %v3384_v58 = vpop.trf.xlu0 }
0x1268   :  { %4315 = vmatprep.mubr.msk.f32.mxu1 %vm144_vm2, %v3384_v58 }
0x126b   :  { %v3385_v59 = vpop.trf.xlu0 }
0x126c   :  { %4316 = vmatmul.mubr.msk.f32.vlgmr.msra.gmra.mrb[16].mxu1 %vm144_vm2, %v3385_v59 }
0x126d   :  { %4502 = vmatpush3.bf16.msra.mxu1 %v4499_v36 }
0x126e   :  { %4504 = vmatprep.subr.bf16.mxu1 %v4503_v45 }
0x1271   :  { %4506 = vmatpush3.bf16.msra.mxu1 %v4503_v45 }
0x1272   :  { %4508 = vmatprep.subr.bf16.mxu1 %v4507_v44 }
0x1275   :  { %4510 = vmatpush3.bf16.msra.mxu1 %v4507_v44 }
0x1276   :  { %4512 = vmatprep.subr.bf16.mxu1 %v4511_v48 }
0x1279   :  { %4514 = vmatpush3.bf16.msra.mxu1 %v4511_v48 }
0x133f   :  { %v4317_v63 = vpop.f32.mrb[16].mxu1 }
0x1340   :  { %v3487_v1 = vadd.f32 %v4317_v63, %v3984_v60  ;;  %v3481_v2 = vpop.f32.mrb[17].mxu1 }
0x1341   :  { %v3482_v3 = vadd.f32 %v3984_v60, %v3481_v2 }
0x1342   :  { %v3491_v4 = vadd.f32 %v3487_v1, %v4900_v0 }
0x1343   :  { %v3490_v5 = vadd.f32 %v3482_v3, %v4896_v62  ;;  %v3532_v62 = vld [vmem:[#allocation2 + $0xe8] sm:$0xff] }
0x1344   :  { %v3497_v6 = vsel %vm144_vm2, %v3491_v4, 0.0  ;;  %v4491_v15 = vpack.c.bf16 %v3533_v12, %v3532_v62 }
0x1345   :  { %3498 = vadd.xlane.f32.xlu0 %v3497_v6  ;;  %v3494_v7 = vsel %vm144_vm2, %v3490_v5, 0.0 }
0x1346   :  { %3495 = vadd.xlane.f32.xlu1 %v3494_v7  ;;  %4492 = vmatprep.subr.bf16.mxu0 %v4491_v15 }
0x1347   :  { %4494 = vmatpush3.bf16.msra.mxu0 %v4491_v15 }
0x1348   :  { %4496 = vmatprep.subr.bf16.mxu0 %v4495_v23 }
0x134b   :  { %4498 = vmatpush3.bf16.msra.mxu0 %v4495_v23 }
0x13d2   :  { %v3499_v8 = vpop.xlane.xlu0 %3498 }
0x13d3   :  { %v3501_v21 = vmul.f32 0.03125, %v3499_v8  ;;  %v3496_v22 = vpop.xlane.xlu1 %3495 }
0x13d4   :  { %v3500_v9 = vmul.f32 0.03125, %v3496_v22 }
0x13d5   :  { %v3503_v10 = vsub.f32 %v3491_v4, %v3501_v21 }
0x13d6   :  { %v3502_v18 = vsub.f32 %v3490_v5, %v3500_v9  ;;  %v3992_v9 = vld [vmem:[#allocation4 + $0x2d] ss:$0 sm:$0xff] }
0x13d7   :  { %v3505_v11 = vmul.f32 %v3503_v10, %v3503_v10 }
0x13d8   :  { %v3504_v19 = vmul.f32 %v3502_v18, %v3502_v18 }
0x13d9   :  { %v3509_v0 = vsel %vm144_vm2, %v3505_v11, 0.0 }
0x13da   :  { %v3506_v20 = vsel %vm144_vm2, %v3504_v19, 0.0 }
0x13db   :  { %3507 = vadd.xlane.f32.xlu1 %v3506_v20 }
0x13df   :  { %3510 = vadd.xlane.f32.xlu1 %v3509_v0 }
0x1468   :  { %v3508_v24 = vpop.xlane.xlu1 %3507 }
0x1469   :  { %v3512_v31 = vmul.f32 0.03125, %v3508_v24 }
0x146b   :  { %v3514_v14 = vadd.f32 1e-05, %v3512_v31 }
0x146c   :  { %v3511_v13 = vpop.xlane.xlu1 %3510 }
0x146d   :  { %4661 = vrsqrt.f32 %v3514_v14  ;;  %v3513_v25 = vmul.f32 0.03125, %v3511_v13 }
0x146f   :  { %v3515_v32 = vadd.f32 1e-05, %v3513_v25 }
0x1471   :  { %4663 = vrsqrt.f32 %v3515_v32 }
0x1477   :  { %v4662_v61 = vpop.eup %4661 }
0x1478   :  { %v3518_v27 = vmul.f32 %v4662_v61, %v3502_v18 }
0x147a   :  { %v3524_v33 = vmul.f32 %v3987_v26, %v3518_v27 }
0x147b   :  { %v4664_v34 = vpop.eup %4663 }
0x147c   :  { %v3519_v57 = vmul.f32 %v4664_v34, %v3503_v10  ;;  %v3530_v35 = vadd.f32 %v3988_v28, %v3524_v33 }
0x147e   :  { %v3525_v37 = vmul.f32 %v3987_v26, %v3519_v57  ;;  %4326 = vmatprep.mubr.msk.f32.mxu0 %vm144_vm2, %v3530_v35 }
0x1480   :  { %v3531_v38 = vadd.f32 %v3988_v28, %v3525_v37 }
0x1482   :  { %4327 = vmatmul.mubr.msk.f32.vlgmr.msra.gmra.mrb[28].mxu0 %vm144_vm2, %v3531_v38 }
0x1555   :  { %v4328_v50 = vpop.f32.mrb[28].mxu0 }
0x1556   :  { %v3619_v51 = vadd.f32 %v4328_v50, %v3989_v49  ;;  %v3613_v40 = vpop.f32.mrb[29].mxu0 }
0x1557   :  { %v3614_v52 = vadd.f32 %v3989_v49, %v3613_v40 }
0x1558   :  { %v3623_v53 = vmul.f32 %v3619_v51, %v3619_v51 }
0x1559   :  { %v3622_v54 = vmul.f32 %v3614_v52, %v3614_v52 }
0x155a   :  { %v3625_v55 = vmul.f32 %v3623_v53, %v3619_v51 }
0x155b   :  { %v3624_v56 = vmul.f32 %v3622_v54, %v3614_v52 }
0x155c   :  { %v3627_v58 = vmul.f32 0.044715, %v3625_v55 }
0x155d   :  { %v3626_v59 = vmul.f32 0.044715, %v3624_v56 }
0x155e   :  { %v3629_v60 = vadd.f32 %v3627_v58, %v3619_v51 }
0x155f   :  { %v3628_v63 = vadd.f32 %v3626_v59, %v3614_v52 }
0x1560   :  { %v3631_v1 = vmul.f32 0.7978846, %v3629_v60 }
0x1561   :  { %v3630_v2 = vmul.f32 0.7978846, %v3628_v63 }
0x1562   :  { %4665 = vtanh.f32 %v3631_v1  ;;  %v3997_v1 = vld [vmem:[#allocation4 + $0x30] ss:$0 sm:$0xff] }
0x1563   :  { %4667 = vtanh.f32 %v3630_v2 }
0x156c   :  { %v4666_v3 = vpop.eup %4665 }
0x156d   :  { %v4668_v4 = vpop.eup %4667  ;;  %v3635_v5 = vadd.f32 1.0, %v4666_v3  ;;  %v3998_v3 = vld [vmem:[#allocation4 + $0x31] ss:$0 sm:$0xff] }
0x156e   :  { %v3634_v6 = vadd.f32 1.0, %v4668_v4 }
0x156f   :  { %v3637_v7 = vmul.f32 0.5, %v3635_v5 }
0x1570   :  { %v3636_v8 = vmul.f32 0.5, %v3634_v6 }
0x1571   :  { %v3639_v22 = vmul.f32 %v3637_v7, %v3619_v51 }
0x1572   :  { %v3638_v21 = vmul.f32 %v3636_v8, %v3614_v52 }
0x1574   :  { %4345 = vmatprep.mubr.msk.f32.mxu1 %vm1834_vm6, %v3638_v21 }
0x1575   :  { %4346 = vmatmul.mubr.msk.f32.vlgmr.msra.gmra.mrb[18].mxu1 %vm1834_vm6, %v3639_v22 }
0x1648   :  { %v4347_v10 = vpop.f32.mrb[18].mxu1 }
0x1649   :  { %v3725_v18 = vpop.f32.mrb[19].mxu1  ;;  %v3731_v19 = vadd.f32 %v4347_v10, %v3992_v9  ;;  %v4729_v10 = vmov 0.0|0.0  }
0x164a   :  { %v3726_v20 = vadd.f32 %v3992_v9, %v3725_v18  ;;  %4515 = vmatprep.subr.bf16.mxu0 %v4729_v10  ;;  %v4731_v18 = vmov 0.0  }
0x164b   :  { %v3735_v0 = vadd.f32 %v3731_v19, %v3531_v38  ;;  %v3996_v38 = vld [vmem:[#allocation4 + $0x2f] ss:$0 sm:$0xff]  ;;  %4352 = vmatprep.mubr.msk.f32.mxu0 %vm4730_vm7, %v4731_v18 }
0x164c   :  { %v3734_v11 = vadd.f32 %v3726_v20, %v3530_v35  ;;  %v3995_v35 = vld [vmem:[#allocation4 + $0x2e] ss:$0 sm:$0xff] }
0x164d   :  { %v3741_v12 = vsel %vm144_vm2, %v3735_v0, 0.0 }
0x164e   :  { %v3738_v62 = vsel %vm144_vm2, %v3734_v11, 0.0 }
0x164f   :  { %3739 = vadd.xlane.f32.xlu1 %v3738_v62 }
0x1653   :  { %3742 = vadd.xlane.f32.xlu1 %v3741_v12 }
0x16dc   :  { %v3740_v15 = vpop.xlane.xlu1 %3739 }
0x16dd   :  { %v3744_v16 = vmul.f32 0.03125, %v3740_v15 }
0x16df   :  { %v3746_v17 = vsub.f32 %v3734_v11, %v3744_v16  ;;  %v3824_v11 = vld [vmem:[#allocation4 + $0x40] sm:$0xff] }
0x16e0   :  { %v3743_v23 = vpop.xlane.xlu1 %3742 }
0x16e1   :  { %v3745_v24 = vmul.f32 0.03125, %v3743_v23  ;;  %v3748_v31 = vmul.f32 %v3746_v17, %v3746_v17  ;;  %v3828_v23 = vld [vmem:[#allocation4 + $0x38] sm:$0xff] }
0x16e3   :  { %v3747_v14 = vsub.f32 %v3735_v0, %v3745_v24  ;;  %v3750_v13 = vsel %vm144_vm2, %v3748_v31, 0.0  ;;  %v3825_v0 = vld [vmem:[#allocation4 + $0x48] sm:$0xff]  ;;  %v3999_v24 = vld [vmem:[#allocation4 + $0x32] ss:$0 sm:$0xff] }
0x16e4   :  { %3751 = vadd.xlane.f32.xlu1 %v3750_v13 }
0x16e5   :  { %v3749_v25 = vmul.f32 %v3747_v14, %v3747_v14 }
0x16e7   :  { %v3753_v32 = vsel %vm144_vm2, %v3749_v25, 0.0 }
0x16e8   :  { %3754 = vadd.xlane.f32.xlu0 %v3753_v32 }
0x1771   :  { %v3752_v61 = vpop.xlane.xlu1 %3751 }
0x1772   :  { %v3756_v26 = vmul.f32 0.03125, %v3752_v61 }
0x1774   :  { %v3758_v27 = vadd.f32 1e-05, %v3756_v26 }
0x1775   :  { %v3755_v28 = vpop.xlane.xlu0 %3754 }
0x1776   :  { %4669 = vrsqrt.f32 %v3758_v27  ;;  %v3757_v33 = vmul.f32 0.03125, %v3755_v28 }
0x1778   :  { %v3759_v34 = vadd.f32 1e-05, %v3757_v33 }
0x177a   :  { %4671 = vrsqrt.f32 %v3759_v34 }
0x1780   :  { %v4670_v57 = vpop.eup %4669 }
0x1781   :  { %v3762_v37 = vmul.f32 %v4670_v57, %v3746_v17 }
0x1783   :  { %v3768_v39 = vmul.f32 %v3995_v35, %v3762_v37 }
0x1784   :  { %v4672_v41 = vpop.eup %4671 }
0x1785   :  { %v3774_v36 = vadd.f32 %v3996_v38, %v3768_v39  ;;  %v3763_v42 = vmul.f32 %v4672_v41, %v3747_v14 }
0x1787   :  { %v3778_v43 = vsel %vm144_vm2, %v3774_v36, 0.0  ;;  %v3769_v45 = vmul.f32 %v3995_v35, %v3763_v42 }
0x1788   :  { %3779 = vadd.xlane.f32.xlu1 %v3778_v43 }
0x1789   :  { %v3775_v30 = vadd.f32 %v3996_v38, %v3769_v45 }
0x178b   :  { %v3781_v29 = vsel %vm144_vm2, %v3775_v30, 0.0 }
0x178c   :  { %3782 = vadd.xlane.f32.xlu0 %v3781_v29 }
0x1815   :  { %v3780_v44 = vpop.xlane.xlu1 %3779 }
0x1816   :  { %v3784_v46 = vmul.f32 0.03125, %v3780_v44 }
0x1818   :  { %v3786_v47 = vsub.f32 %v3774_v36, %v3784_v46 }
0x1819   :  { %v3783_v48 = vpop.xlane.xlu0 %3782 }
0x181a   :  { %v3785_v49 = vmul.f32 0.03125, %v3783_v48  ;;  %v3788_v50 = vmul.f32 %v3786_v47, %v3786_v47 }
0x181c   :  { %v3787_v51 = vsub.f32 %v3775_v30, %v3785_v49  ;;  %v3790_v40 = vsel %vm144_vm2, %v3788_v50, 0.0 }
0x181d   :  { %3791 = vadd.xlane.f32.xlu1 %v3790_v40 }
0x181e   :  { %v3789_v52 = vmul.f32 %v3787_v51, %v3787_v51 }
0x1820   :  { %v3793_v53 = vsel %vm144_vm2, %v3789_v52, 0.0 }
0x1821   :  { %3794 = vadd.xlane.f32.xlu0 %v3793_v53 }
0x18aa   :  { %v3792_v54 = vpop.xlane.xlu1 %3791 }
0x18ab   :  { %v3796_v55 = vmul.f32 0.03125, %v3792_v54 }
0x18ad   :  { %v3798_v56 = vadd.f32 1e-05, %v3796_v55 }
0x18ae   :  { %v3795_v58 = vpop.xlane.xlu0 %3794 }
0x18af   :  { %4673 = vrsqrt.f32 %v3798_v56  ;;  %v3797_v59 = vmul.f32 0.03125, %v3795_v58 }
0x18b1   :  { %v3799_v60 = vadd.f32 1e-05, %v3797_v59 }
0x18b3   :  { %4675 = vrsqrt.f32 %v3799_v60 }
0x18b9   :  { %v4674_v63 = vpop.eup %4673 }
0x18ba   :  { %v3802_v2 = vmul.f32 %v4674_v63, %v3786_v47 }
0x18bc   :  { %v3808_v4 = vmul.f32 %v3997_v1, %v3802_v2 }
0x18bd   :  { %v4676_v5 = vpop.eup %4675 }
0x18be   :  { %v3814_v6 = vadd.f32 %v3998_v3, %v3808_v4  ;;  %v3803_v7 = vmul.f32 %v4676_v5, %v3787_v51 }
0x18c0   :  { %v3816_v8 = vsel %vm144_vm2, %v3814_v6, 0.0  ;;  %v3809_v21 = vmul.f32 %v3997_v1, %v3803_v7 }
0x18c1   :  { %3817 = vadd.xlane.f32.xlu1 %v3816_v8 }
0x18c2   :  { %v3815_v22 = vadd.f32 %v3998_v3, %v3809_v21 }
0x18c4   :  { %v3819_v9 = vsel %vm144_vm2, %v3815_v22, 0.0 }
0x18c5   :  { %3820 = vadd.xlane.f32.xlu0 %v3819_v9 }
0x194e   :  { %v3818_v19 = vpop.xlane.xlu1 %3817 }
0x194f   :  { %v3822_v20 = vmul.f32 0.03125, %v3818_v19 }
0x1951   :  { %v3826_v15 = vmul.f32 %v3824_v11, %v3822_v20 }
0x1952   :  { %v3821_v62 = vpop.xlane.xlu0 %3820 }
0x1953   :  { %v3823_v12 = vmul.f32 0.03125, %v3821_v62 }
0x1955   :  { %v3827_v16 = vmul.f32 %v3825_v0, %v3823_v12 }
0x1957   :  { %v4516_v17 = vpack.c.bf16 %v3827_v16, %v3826_v15 }
0x1959   :  { %4517 = vmatpush3.bf16.msra.mxu0 %v4516_v17 }
0x195c   :  { %4353 = vmatmul.mubr.msk.f32.vlgmr.msra.gmra.mrb[30].mxu0 %vm1007_vm5, %v3828_v23 }
0x1a2f   :  { %v3903_v31 = vpop.f32.mrb[30].mxu0 }
0x1a30   :  { %v3904_v14 = vadd.f32 %v3999_v24, %v3903_v31  ;;  %v4354_v13 = vpop.f32.mrb[31].mxu0 }
0x1a32   :  { %3907 = vst [vmem:[%s5024_s3] sm:$0xff] %v3904_v14 }
0x1a33   :  { %3912 = vsyncpa [#allocation3], 1 }
0x1a34   :  { %3913 = vsyncpa [#allocation5], 1 }

</bundles_post_ra>
